<compile_context>
chip_gen: v7x
topology: tpu7x:2x2x1
jax: 0.10.0
libtpu: 0.0.40
codegen_flags: <defaults>
</compile_context>

<pallas_src>
import functools

import jax
import jax.numpy as jnp
from jax import lax
from jax.experimental import pallas as pl
from jax.experimental.pallas import tpu as pltpu

DEPTHS = (3, 3, 27, 3)          # convnext_base
DIMS = (128, 256, 512, 1024)    # convnext_base
N_CLASSES = 32
EPS = 1e-6
INV_SQRT2 = 0.7071067811865476


def _vmem_limit_bytes():
    try:
        cap = int(pltpu.get_tpu_info().vmem_capacity_bytes)
        return int(min(cap - 8 * 1024 * 1024, 100 * 1024 * 1024))
    except Exception:
        return 48 * 1024 * 1024


_VMEM_LIMIT = _vmem_limit_bytes()


def _cparams(sem=None):
    if sem:
        return pltpu.CompilerParams(dimension_semantics=sem,
                                    vmem_limit_bytes=_VMEM_LIMIT)
    return pltpu.CompilerParams(vmem_limit_bytes=_VMEM_LIMIT)


def _full_spec(shape):
    # single-program pallas_call: whole array is one VMEM block
    return pl.BlockSpec(shape, lambda: (0,) * len(shape))


def _ln_rows(x, g, b):
    # LayerNorm over the last (channel/lane) dim, biased variance, eps=1e-6.
    mean = jnp.mean(x, axis=-1, keepdims=True)
    c = x - mean
    var = jnp.mean(c * c, axis=-1, keepdims=True)
    return c * lax.rsqrt(var + EPS) * g + b


# ---- probe: does pltpu.roll support sublane (axis-0) rotation here? ----------

def _probe_roll():
    try:
        def k(x_ref, o_ref):
            o_ref[...] = pltpu.roll(x_ref[...], shift=51, axis=0)
        x = jnp.arange(256 * 128, dtype=jnp.float32).reshape(256, 128)
        out = pl.pallas_call(
            k, out_shape=jax.ShapeDtypeStruct((256, 128), jnp.float32))(x)
        out = jax.block_until_ready(out)
        return bool(jnp.array_equal(out, jnp.roll(x, 51, axis=0)))
    except Exception:
        return False


_USE_ROLL = _probe_roll()


# --------------------------- fused stage kernel -------------------------------

def _dwconv7(x, dww, dwb, H, W):
    """Depthwise 7x7 conv (padding=3, bias) on a flat (H*W, C) f32 image."""
    HW, C = x.shape
    idx = lax.broadcasted_iota(jnp.int32, (HW, 1), 0)
    hidx = idx // W
    widx = idx - hidx * W
    use_roll = _USE_ROLL and (HW % 8 == 0)
    if not use_roll:
        zpad = jnp.zeros((3 * W + 3, C), jnp.float32)
        xpad = jnp.concatenate([zpad, x, zpad], axis=0)
    acc = jnp.zeros((HW, C), jnp.float32) + dwb
    for kh in range(7):
        dh = kh - 3
        if dh <= -H or dh >= H:          # tap never hits a valid row
            continue
        hm = (hidx >= -dh) & (hidx < H - dh)
        for kw in range(7):
            dw = kw - 3
            if dw <= -W or dw >= W:      # tap never hits a valid column
                continue
            s = dh * W + dw
            if use_roll:
                sh = x if s == 0 else pltpu.roll(x, shift=(-s) % HW, axis=0)
            else:
                sh = xpad[3 * W + 3 + s: 3 * W + 3 + s + HW, :]
            valid = hm & (widx >= -dw) & (widx < W - dw)
            tap = dww[kh * 7 + kw: kh * 7 + kw + 1, :]       # (1, C)
            acc = acc + jnp.where(valid, sh, 0.0) * tap
    return acc


def _stage_kernel(x_ref, dww_ref, dwb_ref, lng_ref, lnb_ref,
                  w1_ref, b1_ref, w2_ref, b2_ref, gam_ref,
                  o_ref, act_ref, *, H, W):
    # grid = (batch n, block d).  act_ref carries the activation across d.
    d = pl.program_id(1)

    @pl.when(d == 0)
    def _():
        act_ref[...] = x_ref[0].astype(jnp.float32)

    x = act_ref[...]                                         # (HW, C) f32
    conv = _dwconv7(x, dww_ref[0], dwb_ref[0], H, W)
    y = _ln_rows(conv, lng_ref[0], lnb_ref[0]).astype(jnp.bfloat16)

    h = jnp.dot(y, w1_ref[0], preferred_element_type=jnp.float32) + b1_ref[0]
    h = 0.5 * h * (1.0 + lax.erf(h * INV_SQRT2))             # exact-erf GELU
    o = jnp.dot(h.astype(jnp.bfloat16), w2_ref[0],
                preferred_element_type=jnp.float32) + b2_ref[0]

    # TODO(synk): StochasticDepth is identity here (eval-mode semantics).
    newact = x + o * gam_ref[0]
    act_ref[...] = newact

    @pl.when(d == pl.num_programs(1) - 1)
    def _():
        o_ref[0] = newact.astype(o_ref.dtype)


@functools.partial(jax.jit, static_argnames=("H", "W"))
def _stage_apply(x, sp, *, H, W):
    # x: (N, H*W, C) bf16 -> same shape/dtype, all `depth` blocks applied.
    N, HW, C = x.shape
    depth = sp["dw_w"].shape[0]
    hidden = sp["w1"].shape[-1]
    wmap = lambda n, d: (d, 0, 0)        # stacked per-block weights
    amap = lambda n, d: (n, 0, 0)        # per-image activation (resident in d)
    kernel = functools.partial(_stage_kernel, H=H, W=W)
    return pl.pallas_call(
        kernel,
        out_shape=jax.ShapeDtypeStruct((N, HW, C), x.dtype),
        grid=(N, depth),
        in_specs=[
            pl.BlockSpec((1, HW, C), amap),
            pl.BlockSpec((1, 49, C), wmap),
            pl.BlockSpec((1, 1, C), wmap),
            pl.BlockSpec((1, 1, C), wmap),
            pl.BlockSpec((1, 1, C), wmap),
            pl.BlockSpec((1, C, hidden), wmap),
            pl.BlockSpec((1, 1, hidden), wmap),
            pl.BlockSpec((1, hidden, C), wmap),
            pl.BlockSpec((1, 1, C), wmap),
            pl.BlockSpec((1, 1, C), wmap),
        ],
        out_specs=pl.BlockSpec((1, HW, C), amap),
        scratch_shapes=[pltpu.VMEM((HW, C), jnp.float32)],   # carried activation
        compiler_params=_cparams(("parallel", "arbitrary")),
    )(x, sp["dw_w"], sp["dw_b"], sp["ln_g"], sp["ln_b"],
      sp["w1"], sp["b1"], sp["w2"], sp["b2"], sp["gamma"])


# --------------------------- stem: 4x4 conv + LayerNorm ----------------------

def _stem_kernel(x_ref, w_ref, b_ref, g_ref, bt_ref, o_ref):
    acc = jnp.dot(x_ref[...], w_ref[...],
                  preferred_element_type=jnp.float32) + b_ref[...]
    o_ref[...] = _ln_rows(acc, g_ref[...], bt_ref[...]).astype(o_ref.dtype)


@jax.jit
def _stem_apply(x_nchw, w, b, g, bt):
    x = jnp.transpose(x_nchw, (0, 2, 3, 1)).astype(jnp.float32)   # NCHW->NHWC
    N, Hin, Win, Cin = x.shape
    H, W = Hin // 4, Win // 4
    p = x.reshape(N, H, 4, W, 4, Cin).transpose(0, 1, 3, 2, 4, 5)
    p = p.reshape(N * H * W, 16 * Cin)                            # (kh, kw, cin)
    M, K = p.shape
    Kp = w.shape[0]                                               # 128 (zero-padded K)
    p = jnp.pad(p, ((0, 0), (0, Kp - K))).astype(jnp.bfloat16)
    Cout = w.shape[1]
    tm = 256 if M % 256 == 0 else M
    out = pl.pallas_call(
        _stem_kernel,
        out_shape=jax.ShapeDtypeStruct((M, Cout), jnp.bfloat16),
        grid=(M // tm,),
        in_specs=[pl.BlockSpec((tm, Kp), lambda i: (i, 0)),
                  pl.BlockSpec((Kp, Cout), lambda i: (0, 0)),
                  pl.BlockSpec((1, Cout), lambda i: (0, 0)),
                  pl.BlockSpec((1, Cout), lambda i: (0, 0)),
                  pl.BlockSpec((1, Cout), lambda i: (0, 0))],
        out_specs=pl.BlockSpec((tm, Cout), lambda i: (i, 0)),
        compiler_params=_cparams(("parallel",)),
    )(p, w, b, g, bt)
    return out.reshape(N, H * W, Cout)


# --------------------------- downsample: LayerNorm + 2x2 conv ----------------

def _down_kernel(xp_ref, g_ref, bt_ref, w_ref, b_ref, o_ref):
    g = g_ref[...]
    bt = bt_ref[...]
    taps = [_ln_rows(xp_ref[j].astype(jnp.float32), g, bt).astype(jnp.bfloat16)
            for j in range(4)]
    xc = jnp.concatenate(taps, axis=-1)                  # (rows, 4C) fused K
    acc = jnp.dot(xc, w_ref[...], preferred_element_type=jnp.float32) + b_ref[...]
    o_ref[...] = acc.astype(o_ref.dtype)


@functools.partial(jax.jit, static_argnames=("H", "W"))
def _down_apply(x, dn, *, H, W):
    # x: (N, H*W, C) -> (N, (H/2)*(W/2), Cout); one fused matmul, one grid step.
    N, HW, C = x.shape
    Cout = dn["w"].shape[-1]
    Ho, Wo = H // 2, W // 2
    xs = x.reshape(N, Ho, 2, Wo, 2, C).transpose(2, 4, 0, 1, 3, 5)
    xp = xs.reshape(4, N * Ho * Wo, C)                   # tap-major layout
    M = xp.shape[1]
    out = pl.pallas_call(
        _down_kernel,
        out_shape=jax.ShapeDtypeStruct((M, Cout), jnp.bfloat16),
        in_specs=[_full_spec((4, M, C)), _full_spec((1, C)), _full_spec((1, C)),
                  _full_spec((4 * C, Cout)), _full_spec((1, Cout))],
        out_specs=_full_spec((M, Cout)),
        compiler_params=_cparams(),
    )(xp, dn["ln_g"], dn["ln_b"], dn["w"], dn["b"])
    return out.reshape(N, Ho * Wo, Cout)


# --------------------------- head: global avg pool + Linear ------------------

def _head_kernel(x_ref, w_ref, b_ref, o_ref):
    pooled = jnp.mean(x_ref[...].astype(jnp.float32), axis=1)      # (N, C)
    acc = jnp.dot(pooled.astype(jnp.bfloat16), w_ref[...],
                  preferred_element_type=jnp.float32) + b_ref[...]
    o_ref[...] = acc.astype(o_ref.dtype)


@functools.partial(jax.jit, static_argnames=("n_classes",))
def _head_apply(x, w, b, *, n_classes):
    # avgpool(1) + Flatten + Dropout + Linear; output padded to 128 lanes.
    # TODO(synk): Dropout(p=0.2) is identity (inference); no training-mode mask.
    # Note: classifier is Flatten->Dropout->Linear per the spec (the stock
    # torchvision pre-head LayerNorm2d is intentionally not present).
    N, HW, C = x.shape
    Cp = w.shape[1]
    out = pl.pallas_call(
        _head_kernel,
        out_shape=jax.ShapeDtypeStruct((N, Cp), jnp.float32),
        in_specs=[_full_spec((N, HW, C)), _full_spec((C, Cp)), _full_spec((1, Cp))],
        out_specs=_full_spec((N, Cp)),
        compiler_params=_cparams(),
    )(x, w, b)
    return out[:, :n_classes]


# --------------------------- model glue (Python driver) ----------------------

def convnext_forward(params, x_nchw, n_classes=N_CLASSES):
    _, _, Hin, Win = x_nchw.shape
    H, W = Hin // 4, Win // 4
    x = _stem_apply(x_nchw, params["stem_w"], params["stem_b"],
                    params["stem_ln_g"], params["stem_ln_b"])       # (N, HW, 128) bf16
    for si in range(len(DIMS)):
        x = _stage_apply(x, params["stages"][si], H=H, W=W)
        if si < len(DIMS) - 1:
            x = _down_apply(x, params["downs"][si], H=H, W=W)
            H, W = H // 2, W // 2
    return _head_apply(x, params["head_w"], params["head_b"], n_classes=n_classes)


# --------------------------- deterministic init ------------------------------

def init_params(key, n_classes=N_CLASSES):
    counter = [0]

    def nk():
        counter[0] += 1
        return jax.random.fold_in(key, counter[0])

    params = {}
    # Stem: Conv2d(3,128,k=4,s=4) as a (K=48, zero-padded to 128) matmul + LN.
    sw = (jax.random.normal(nk(), (48, DIMS[0]), jnp.float32) * 0.02).astype(jnp.bfloat16)
    params["stem_w"] = jnp.zeros((128, DIMS[0]), jnp.bfloat16).at[:48, :].set(sw)
    params["stem_b"] = jnp.zeros((1, DIMS[0]), jnp.float32)
    params["stem_ln_g"] = jnp.ones((1, DIMS[0]), jnp.float32)
    params["stem_ln_b"] = jnp.zeros((1, DIMS[0]), jnp.float32)

    stages, downs = [], []
    for si, (depth, dim) in enumerate(zip(DEPTHS, DIMS)):
        hidden = 4 * dim
        stages.append({
            "dw_w": jax.random.normal(nk(), (depth, 49, dim), jnp.float32) * 0.02,
            "dw_b": jnp.zeros((depth, 1, dim), jnp.float32),
            "ln_g": jnp.ones((depth, 1, dim), jnp.float32),
            "ln_b": jnp.zeros((depth, 1, dim), jnp.float32),
            "gamma": jnp.full((depth, 1, dim), 1e-6, jnp.float32),
            "w1": (jax.random.normal(nk(), (depth, dim, hidden), jnp.float32)
                   * 0.02).astype(jnp.bfloat16),
            "b1": jnp.zeros((depth, 1, hidden), jnp.float32),
            "w2": (jax.random.normal(nk(), (depth, hidden, dim), jnp.float32)
                   * 0.02).astype(jnp.bfloat16),
            "b2": jnp.zeros((depth, 1, dim), jnp.float32),
        })
        if si < len(DIMS) - 1:
            # TODO(synk): synthetic weights only; loading a real torchvision
            # checkpoint would need explicit (cout,cin,kh,kw) permutations.
            downs.append({
                "ln_g": jnp.ones((1, dim), jnp.float32),
                "ln_b": jnp.zeros((1, dim), jnp.float32),
                "w": (jax.random.normal(nk(), (4 * dim, DIMS[si + 1]), jnp.float32)
                      * 0.02).astype(jnp.bfloat16),   # K order = (kh*2+kw, cin)
                "b": jnp.zeros((1, DIMS[si + 1]), jnp.float32),
            })
    params["stages"] = stages
    params["downs"] = downs

    ncls_pad = ((n_classes + 127) // 128) * 128          # lane-dense classifier out
    hw_ = (jax.random.normal(nk(), (DIMS[-1], n_classes), jnp.float32)
           * 0.02).astype(jnp.bfloat16)
    params["head_w"] = jnp.zeros((DIMS[-1], ncls_pad), jnp.bfloat16).at[:, :n_classes].set(hw_)
    params["head_b"] = jnp.zeros((1, ncls_pad), jnp.float32)
    return params


# --------------------------- main --------------------------------------------

if __name__ == "__main__":
    key = jax.random.PRNGKey(0)
    pkey, xkey = jax.random.split(key)
    params = init_params(pkey, n_classes=N_CLASSES)

    # NCHW input like the PyTorch module (64x64 -> 16x16 after the stem).
    x = jax.random.normal(xkey, (2, 3, 64, 64), jnp.float32)

    out = convnext_forward(params, x)
    out = jax.block_until_ready(out)

    assert out.shape == (2, N_CLASSES), out.shape
    assert bool(jnp.all(jnp.isfinite(out)))
    print("KERNEL_OK")
</pallas_src>

<mosaic_0001>
module attributes {stable_mosaic.version = 11 : i64} {
  func.func @k(%arg0: memref<256x128xf32, #tpu.memory_space<vmem>>, %arg1: memref<256x128xf32, #tpu.memory_space<vmem>>) attributes {dimension_semantics = [], scalar_prefetch = 0 : i64, scratch_operands = 0 : i64, tpu.core_type = #tpu.core_type<tc>} {
    %c0 = arith.constant 0 : index
    %c0_0 = arith.constant 0 : index
    %0 = vector.load %arg0[%c0, %c0_0] : memref<256x128xf32, #tpu.memory_space<vmem>>, vector<256x128xf32>
    %c51_i32 = arith.constant 51 : i32
    %1 = tpu.dynamic_rotate %0 by %c51_i32 dim 0 : vector<256x128xf32>, i32 -> vector<256x128xf32>
    %c0_1 = arith.constant 0 : index
    %c0_2 = arith.constant 0 : index
    %2 = vector.load %arg1[%c0_1, %c0_2] : memref<256x128xf32, #tpu.memory_space<vmem>>, vector<256x128xf32>
    tpu.vector_store %arg1[%c0_1, %c0_2], %1 {strides = array<i32>} : memref<256x128xf32, #tpu.memory_space<vmem>>, vector<256x128xf32>,
    return
  }
}

module attributes {stable_mosaic.version = 11 : i64} {
  func.func @_stem_kernel(%arg0: i32, %arg1: memref<256x128xbf16, #tpu.memory_space<vmem>>, %arg2: memref<128x128xbf16, #tpu.memory_space<vmem>>, %arg3: memref<1x128xf32, #tpu.memory_space<vmem>>, %arg4: memref<1x128xf32, #tpu.memory_space<vmem>>, %arg5: memref<1x128xf32, #tpu.memory_space<vmem>>, %arg6: memref<256x128xbf16, #tpu.memory_space<vmem>>) attributes {dimension_semantics = [#tpu.dimension_semantics<parallel>], iteration_bounds = array<i64: 2>, scalar_prefetch = 0 : i64, scratch_operands = 0 : i64, tpu.core_type = #tpu.core_type<tc>, window_params = [{transform_indices = @transform_0, window_bounds = array<i64: 256, 128>}, {pipeline_mode = #tpu.pipeline_mode<synchronous>, transform_indices = @transform_1, window_bounds = array<i64: 128, 128>}, {pipeline_mode = #tpu.pipeline_mode<synchronous>, transform_indices = @transform_2, window_bounds = array<i64: 1, 128>}, {pipeline_mode = #tpu.pipeline_mode<synchronous>, transform_indices = @transform_3, window_bounds = array<i64: 1, 128>}, {pipeline_mode = #tpu.pipeline_mode<synchronous>, transform_indices = @transform_4, window_bounds = array<i64: 1, 128>}, {transform_indices = @transform_5, window_bounds = array<i64: 256, 128>}]} {
    %c0 = arith.constant 0 : index
    %c0_0 = arith.constant 0 : index
    %0 = vector.load %arg1[%c0, %c0_0] : memref<256x128xbf16, #tpu.memory_space<vmem>>, vector<256x128xbf16>
    %c0_1 = arith.constant 0 : index
    %c0_2 = arith.constant 0 : index
    %1 = vector.load %arg2[%c0_1, %c0_2] : memref<128x128xbf16, #tpu.memory_space<vmem>>, vector<128x128xbf16>
    %cst = arith.constant dense<0.000000e+00> : vector<256x128xf32>
    %2 = tpu.matmul %0, %1, %cst {dimension_numbers = #tpu.dot_dimension_numbers<[1], [0], [0], [1], [0, 0, 1, 1], [], []>} : vector<256x128xbf16>, vector<128x128xbf16>, vector<256x128xf32> -> vector<256x128xf32>
    %c0_3 = arith.constant 0 : index
    %c0_4 = arith.constant 0 : index
    %3 = vector.load %arg3[%c0_3, %c0_4] : memref<1x128xf32, #tpu.memory_space<vmem>>, vector<1x128xf32>
    %4 = vector.broadcast %3 : vector<1x128xf32> to vector<256x128xf32>
    %5 = arith.addf %2, %4 : vector<256x128xf32>
    %c0_5 = arith.constant 0 : index
    %c0_6 = arith.constant 0 : index
    %6 = vector.load %arg4[%c0_5, %c0_6] : memref<1x128xf32, #tpu.memory_space<vmem>>, vector<1x128xf32>
    %c0_7 = arith.constant 0 : index
    %c0_8 = arith.constant 0 : index
    %7 = vector.load %arg5[%c0_7, %c0_8] : memref<1x128xf32, #tpu.memory_space<vmem>>, vector<1x128xf32>
    %cst_9 = arith.constant dense<0.000000e+00> : vector<256xf32>
    %8 = vector.multi_reduction <add>, %5, %cst_9 [1] : vector<256x128xf32> to vector<256xf32>
    %9 = vector.shape_cast %8 : vector<256xf32> to vector<256x1xf32>
    %cst_10 = arith.constant 1.280000e+02 : f32
    %10 = vector.broadcast %cst_10 : f32 to vector<256x1xf32>
    %11 = arith.divf %9, %10 : vector<256x1xf32>
    %12 = vector.broadcast %11 : vector<256x1xf32> to vector<256x128xf32>
    %13 = arith.subf %5, %12 : vector<256x128xf32>
    %14 = arith.mulf %13, %13 : vector<256x128xf32>
    %cst_11 = arith.constant dense<0.000000e+00> : vector<256xf32>
    %15 = vector.multi_reduction <add>, %14, %cst_11 [1] : vector<256x128xf32> to vector<256xf32>
    %16 = vector.shape_cast %15 : vector<256xf32> to vector<256x1xf32>
    %cst_12 = arith.constant 1.280000e+02 : f32
    %17 = vector.broadcast %cst_12 : f32 to vector<256x1xf32>
    %18 = arith.divf %16, %17 : vector<256x1xf32>
    %cst_13 = arith.constant 9.99999997E-7 : f32
    %19 = vector.broadcast %cst_13 : f32 to vector<256x1xf32>
    %20 = arith.addf %18, %19 : vector<256x1xf32>
    %21 = math.rsqrt %20 : vector<256x1xf32>
    %22 = vector.broadcast %21 : vector<256x1xf32> to vector<256x128xf32>
    %23 = arith.mulf %13, %22 : vector<256x128xf32>
    %24 = vector.broadcast %6 : vector<1x128xf32> to vector<256x128xf32>
    %25 = arith.mulf %23, %24 : vector<256x128xf32>
    %26 = vector.broadcast %7 : vector<1x128xf32> to vector<256x128xf32>
    %27 = arith.addf %25, %26 : vector<256x128xf32>
    %28 = arith.truncf %27 : vector<256x128xf32> to vector<256x128xbf16>
    %c0_14 = arith.constant 0 : index
    %c0_15 = arith.constant 0 : index
    %29 = vector.load %arg6[%c0_14, %c0_15] : memref<256x128xbf16, #tpu.memory_space<vmem>>, vector<256x128xbf16>
    tpu.vector_store %arg6[%c0_14, %c0_15], %28 {strides = array<i32>} : memref<256x128xbf16, #tpu.memory_space<vmem>>, vector<256x128xbf16>,
    return
  }
  func.func @transform_0(%arg0: i32) -> (i32, i32) {
    %c0_i32 = arith.constant 0 : i32
    %c0_i32_0 = arith.constant 0 : i32
    return %arg0, %c0_i32 : i32, i32
  }
  func.func @transform_1(%arg0: i32) -> (i32, i32) {
    %c0_i32 = arith.constant 0 : i32
    %c0_i32_0 = arith.constant 0 : i32
    %c0_i32_1 = arith.constant 0 : i32
    return %c0_i32, %c0_i32_0 : i32, i32
  }
  func.func @transform_2(%arg0: i32) -> (i32, i32) {
    %c0_i32 = arith.constant 0 : i32
    %c0_i32_0 = arith.constant 0 : i32
    %c0_i32_1 = arith.constant 0 : i32
    return %c0_i32, %c0_i32_0 : i32, i32
  }
  func.func @transform_3(%arg0: i32) -> (i32, i32) {
    %c0_i32 = arith.constant 0 : i32
    %c0_i32_0 = arith.constant 0 : i32
    %c0_i32_1 = arith.constant 0 : i32
    return %c0_i32, %c0_i32_0 : i32, i32
  }
  func.func @transform_4(%arg0: i32) -> (i32, i32) {
    %c0_i32 = arith.constant 0 : i32
    %c0_i32_0 = arith.constant 0 : i32
    %c0_i32_1 = arith.constant 0 : i32
    return %c0_i32, %c0_i32_0 : i32, i32
  }
  func.func @transform_5(%arg0: i32) -> (i32, i32) {
    %c0_i32 = arith.constant 0 : i32
    %c0_i32_0 = arith.constant 0 : i32
    return %arg0, %c0_i32 : i32, i32
  }
}

</mosaic_0001>

<bundles_post_ra>
// kernel: tpu_custom_call.1
= control target key start
LH: loop header
LB: loop body
LE: loop exit
PB: predicated region body
PF: predicated region fallthrough
CT: control target
= control target key end

     0   :  { %6 = vsyncpa [#allocation3], 0  ;;  %s341_s0 = inlined_call_operand.hbm [shape: f32[256,128], index: 0, kind: input, shape index: {}]   ;;  %s342_s1 = inlined_call_operand.hbm [shape: f32[256,128], index: 1, kind: output, shape index: {}]  }
   0x1   :  { %7 = vsyncpa [#allocation4], 0  ;;  %s223_s6 = smov [#allocation2]   ;;  %s175_s10 = scalar_lea.hbm %s341_s0, 4096 }
   0x2   :  { %s13_s7 = sshll.u32 %s223_s6, 4  ;;  %p176_p0 = scmp.ne.s32.totalorder %s341_s0, %s175_s10  ;;  %s14_s7 = int_to_ptr.vmem [resolvable:$true] %s13_s7 }
   0x3   :  { %p179_p1 = scmp.lt.u32.totalorder %s175_s10, %s341_s0 }
   0x5   :  { %p181_p2 = pnand %p179_p1, %p176_p0 }
   0x7   :  { %184 = shalt.err (!%p181_p2)
}
   0x8   :  { %s185_s15 = scalar_lea.vmem %s14_s7, 4096  ;;  %p190_p4 = scmp.lt.s32.totalorder %s14_s7, %s14_s7 }
   0x9   :  { %p186_p3 = scmp.ne.s32.totalorder %s14_s7, %s185_s15  ;;  %p191_p5 = scmp.lt.s32.totalorder %s185_s15, %s185_s15 }
   0xb   :  { %p192_p6 = por %p191_p5, %p190_p4 }
   0xd   :  { %p193_p7 = pnand %p192_p6, %p186_p3 }
   0xf   :  { %196 = shalt.err (!%p193_p7)
}
  0x10   :  { %s224_s16 = smov 128   ;;  %s225_s17 = smov 8  }
  0x11   :  { %19 = dma.hbm_to_vmem [thread:$0]  %s341_s0, 4096, %s14_s7, [#allocation3], %s224_s16, %s224_s16, %s225_s17  }
  0x12   :  { %219 = dma.done.wait [#allocation3], 4096  }
  0x13   :  { %220 = vsyncadd [#allocation3], 4294963200  ;;  %v87_v0 = vlaneseq  ;;  %v254_v2 = vld [vmem:[#allocation2 + $0xc8] sm:$0xff]  ;;  %v49_v3 = vld [vmem:[#allocation2 + $0xd0] sm:$0xff]  ;;  %s226_s0 = smov [#allocation5]  }
  0x14   :  { %v50_v4 = vld [vmem:[#allocation2 + $0xd8] sm:$0xff]  ;;  %v80_v5 = vrot.slane %v254_v2, 5  ;;  %v81_v6 = vrot.slane %v49_v3, 5  ;;  %v51_v8 = vld [vmem:[#allocation2 + $0xe0] sm:$0xff]  ;;  %v52_v9 = vld [vmem:[#allocation2 + $0xe8] sm:$0xff]  ;;  %s159_s20 = sshll.u32 %s226_s0, 4  ;;  %s160_s20 = int_to_ptr.vmem [resolvable:$true] %s159_s20 }
  0x15   :  { %v252_v1 = vshrl.u32 %v87_v0, 7  ;;  %v82_v7 = vrot.slane %v50_v4, 5  ;;  %v53_v10 = vld [vmem:[#allocation2 + $0xf0] sm:$0xff]  ;;  %v83_v11 = vrot.slane %v51_v8, 5  ;;  %v84_v12 = vrot.slane %v52_v9, 5  ;;  %v54_v14 = vld [vmem:[#allocation2 + $0xf8] sm:$0xff]  ;;  %p202_p9 = scmp.lt.s32.totalorder %s160_s20, %s160_s20 }
  0x16   :  { %v85_v13 = vrot.slane %v53_v10, 5  ;;  %v23_v15 = vld [vmem:[#allocation2] sm:$0xff]  ;;  %v24_v16 = vld [vmem:[#allocation2 + $0x8] sm:$0xff]  ;;  %v86_v19 = vrot.slane %v54_v14, 5  ;;  %v25_v21 = vld [vmem:[#allocation2 + $0x10] sm:$0xff]  ;;  %s197_s21 = scalar_lea.vmem %s160_s20, 4096 }
  0x17   :  { %vm89_vm0 = vcmp.lt.s32.totalorder %v252_v1, 3  ;;  %v55_v20 = vrot.slane %v23_v15, 5  ;;  %v26_v22 = vld [vmem:[#allocation2 + $0x18] sm:$0xff]  ;;  %v27_v23 = vld [vmem:[#allocation2 + $0x20] sm:$0xff]  ;;  %v56_v27 = vrot.slane %v24_v16, 5  ;;  %v28_v28 = vld [vmem:[#allocation2 + $0x28] sm:$0xff]  ;;  %p198_p8 = scmp.ne.s32.totalorder %s160_s20, %s197_s21  ;;  %p203_p10 = scmp.lt.s32.totalorder %s197_s21, %s197_s21 }
  0x18   :  { %v95_v17 = vsel %vm89_vm0, %v80_v5, %v81_v6  ;;  %v94_v18 = vsel %vm89_vm0, %v81_v6, %v82_v7  ;;  %v93_v24 = vsel %vm89_vm0, %v82_v7, %v83_v11  ;;  %v92_v25 = vsel %vm89_vm0, %v83_v11, %v84_v12  ;;  %v29_v29 = vld [vmem:[#allocation2 + $0x30] sm:$0xff]  ;;  %v30_v30 = vld [vmem:[#allocation2 + $0x38] sm:$0xff]  ;;  %v31_v35 = vld [vmem:[#allocation2 + $0x40] sm:$0xff] }
  0x19   :  { %122 = vst [vmem:[#allocation5] sm:$0xff] %v95_v17  ;;  %123 = vst [vmem:[#allocation5 + $0x8] sm:$0xff] %v94_v18  ;;  %v91_v26 = vsel %vm89_vm0, %v84_v12, %v85_v13  ;;  %v90_v31 = vsel %vm89_vm0, %v85_v13, %v86_v19  ;;  %v121_v32 = vsel %vm89_vm0, %v86_v19, %v55_v20  ;;  %v57_v33 = vrot.slane %v25_v21, 5  ;;  %v32_v36 = vld [vmem:[#allocation2 + $0x48] sm:$0xff]  ;;  %v33_v41 = vld [vmem:[#allocation2 + $0x50] sm:$0xff]  ;;  %p204_p11 = por %p203_p10, %p202_p9 }
  0x1a   :  { %124 = vst [vmem:[#allocation5 + $0x10] sm:$0xff] %v93_v24  ;;  %125 = vst [vmem:[#allocation5 + $0x18] sm:$0xff] %v92_v25  ;;  %v58_v34 = vrot.slane %v26_v22, 5  ;;  %v120_v37 = vsel %vm89_vm0, %v55_v20, %v56_v27  ;;  %v59_v38 = vrot.slane %v27_v23, 5  ;;  %v60_v39 = vrot.slane %v28_v28, 5  ;;  %v34_v42 = vld [vmem:[#allocation2 + $0x58] sm:$0xff] }
  0x1b   :  { %126 = vst [vmem:[#allocation5 + $0x20] sm:$0xff] %v91_v26  ;;  %127 = vst [vmem:[#allocation5 + $0x28] sm:$0xff] %v90_v31  ;;  %v61_v40 = vrot.slane %v29_v29, 5  ;;  %v119_v43 = vsel %vm89_vm0, %v56_v27, %v57_v33  ;;  %v62_v45 = vrot.slane %v30_v30, 5  ;;  %v63_v46 = vrot.slane %v31_v35, 5  ;;  %v35_v47 = vld [vmem:[#allocation2 + $0x60] sm:$0xff]  ;;  %p205_p12 = pnand %p204_p11, %p198_p8 }
  0x1c   :  { %128 = vst [vmem:[#allocation5 + $0x30] sm:$0xff] %v121_v32  ;;  %129 = vst [vmem:[#allocation5 + $0x38] sm:$0xff] %v120_v37  ;;  %v118_v44 = vsel %vm89_vm0, %v57_v33, %v58_v34  ;;  %v36_v48 = vld [vmem:[#allocation2 + $0x68] sm:$0xff]  ;;  %v37_v49 = vld [vmem:[#allocation2 + $0x70] sm:$0xff]  ;;  %v117_v50 = vsel %vm89_vm0, %v58_v34, %v59_v38  ;;  %v116_v51 = vsel %vm89_vm0, %v59_v38, %v60_v39  ;;  %v64_v53 = vrot.slane %v32_v36, 5 }
  0x1d   :  { %130 = vst [vmem:[#allocation5 + $0x40] sm:$0xff] %v119_v43  ;;  %131 = vst [vmem:[#allocation5 + $0x48] sm:$0xff] %v118_v44  ;;  %v115_v52 = vsel %vm89_vm0, %v60_v39, %v61_v40  ;;  %v38_v54 = vld [vmem:[#allocation2 + $0x78] sm:$0xff]  ;;  %v39_v55 = vld [vmem:[#allocation2 + $0x80] sm:$0xff]  ;;  %v114_v56 = vsel %vm89_vm0, %v61_v40, %v62_v45  ;;  %v113_v57 = vsel %vm89_vm0, %v62_v45, %v63_v46  ;;  %v65_v58 = vrot.slane %v33_v41, 5 }
  0x1e   :  { %132 = vst [vmem:[#allocation5 + $0x50] sm:$0xff] %v117_v50  ;;  %133 = vst [vmem:[#allocation5 + $0x58] sm:$0xff] %v116_v51  ;;  %v66_v59 = vrot.slane %v34_v42, 5  ;;  %v40_v60 = vld [vmem:[#allocation2 + $0x88] sm:$0xff]  ;;  %v112_v61 = vsel %vm89_vm0, %v63_v46, %v64_v53  ;;  %v67_v62 = vrot.slane %v35_v47, 5  ;;  %v68_v63 = vrot.slane %v36_v48, 5 }
  0x1f   :  { %134 = vst [vmem:[#allocation5 + $0x60] sm:$0xff] %v115_v52  ;;  %135 = vst [vmem:[#allocation5 + $0x68] sm:$0xff] %v114_v56  ;;  %v69_v0 = vrot.slane %v37_v49, 5  ;;  %v41_v3 = vld [vmem:[#allocation2 + $0x90] sm:$0xff]  ;;  %v42_v4 = vld [vmem:[#allocation2 + $0x98] sm:$0xff]  ;;  %v111_v6 = vsel %vm89_vm0, %v64_v53, %v65_v58  ;;  %v70_v8 = vrot.slane %v38_v54, 5 }
  0x20   :  { %136 = vst [vmem:[#allocation5 + $0x70] sm:$0xff] %v113_v57  ;;  %137 = vst [vmem:[#allocation5 + $0x78] sm:$0xff] %v112_v61  ;;  %v110_v7 = vsel %vm89_vm0, %v65_v58, %v66_v59  ;;  %v71_v9 = vrot.slane %v39_v55, 5  ;;  %v43_v10 = vld [vmem:[#allocation2 + $0xa0] sm:$0xff]  ;;  %v44_v11 = vld [vmem:[#allocation2 + $0xa8] sm:$0xff]  ;;  %v109_v13 = vsel %vm89_vm0, %v66_v59, %v67_v62  ;;  %v108_v14 = vsel %vm89_vm0, %v67_v62, %v68_v63 }
  0x21   :  { %v45_v12 = vld [vmem:[#allocation2 + $0xb0] sm:$0xff]  ;;  %138 = vst [vmem:[#allocation5 + $0x80] sm:$0xff] %v111_v6  ;;  %139 = vst [vmem:[#allocation5 + $0x88] sm:$0xff] %v110_v7  ;;  %v107_v15 = vsel %vm89_vm0, %v68_v63, %v69_v0  ;;  %v72_v16 = vrot.slane %v40_v60, 5  ;;  %v46_v17 = vld [vmem:[#allocation2 + $0xb8] sm:$0xff]  ;;  %v106_v19 = vsel %vm89_vm0, %v69_v0, %v70_v8  ;;  %v73_v21 = vrot.slane %v41_v3, 5 }
  0x22   :  { %v47_v18 = vld [vmem:[#allocation2 + $0xc0] sm:$0xff]  ;;  %140 = vst [vmem:[#allocation5 + $0x90] sm:$0xff] %v109_v13  ;;  %141 = vst [vmem:[#allocation5 + $0x98] sm:$0xff] %v108_v14  ;;  %v105_v20 = vsel %vm89_vm0, %v70_v8, %v71_v9  ;;  %v74_v22 = vrot.slane %v42_v4, 5  ;;  %v75_v24 = vrot.slane %v43_v10, 5  ;;  %v76_v25 = vrot.slane %v44_v11, 5 }
  0x23   :  { %142 = vst [vmem:[#allocation5 + $0xa0] sm:$0xff] %v107_v15  ;;  %143 = vst [vmem:[#allocation5 + $0xa8] sm:$0xff] %v106_v19  ;;  %v104_v23 = vsel %vm89_vm0, %v71_v9, %v72_v16  ;;  %v77_v26 = vrot.slane %v45_v12, 5  ;;  %v103_v27 = vsel %vm89_vm0, %v72_v16, %v73_v21  ;;  %v78_v29 = vrot.slane %v46_v17, 5 }
  0x24   :  { %144 = vst [vmem:[#allocation5 + $0xb0] sm:$0xff] %v105_v20  ;;  %145 = vst [vmem:[#allocation5 + $0xb8] sm:$0xff] %v104_v23  ;;  %v102_v28 = vsel %vm89_vm0, %v73_v21, %v74_v22  ;;  %v79_v30 = vrot.slane %v47_v18, 5  ;;  %v101_v31 = vsel %vm89_vm0, %v74_v22, %v75_v24  ;;  %v100_v32 = vsel %vm89_vm0, %v75_v24, %v76_v25 }
  0x25   :  { %146 = vst [vmem:[#allocation5 + $0xc0] sm:$0xff] %v103_v27  ;;  %147 = vst [vmem:[#allocation5 + $0xc8] sm:$0xff] %v102_v28  ;;  %v99_v33 = vsel %vm89_vm0, %v76_v25, %v77_v26  ;;  %v98_v34 = vsel %vm89_vm0, %v77_v26, %v78_v29 }
  0x26   :  { %148 = vst [vmem:[#allocation5 + $0xd0] sm:$0xff] %v101_v31  ;;  %149 = vst [vmem:[#allocation5 + $0xd8] sm:$0xff] %v100_v32  ;;  %v97_v35 = vsel %vm89_vm0, %v78_v29, %v79_v30  ;;  %v96_v36 = vsel %vm89_vm0, %v79_v30, %v80_v5 }
  0x27   :  { %150 = vst [vmem:[#allocation5 + $0xe0] sm:$0xff] %v99_v33  ;;  %151 = vst [vmem:[#allocation5 + $0xe8] sm:$0xff] %v98_v34 }
  0x28   :  { %152 = vst [vmem:[#allocation5 + $0xf0] sm:$0xff] %v97_v35  ;;  %153 = vst [vmem:[#allocation5 + $0xf8] sm:$0xff] %v96_v36 }
  0x29   :  { %208 = shalt.err (!%p205_p12)
}
  0x2a   :  { %s209_s24 = scalar_lea.hbm %s342_s1, 4096 }
  0x2b   :  { %p210_p13 = scmp.ne.s32.totalorder %s342_s1, %s209_s24  ;;  %p213_p0 = scmp.lt.u32.totalorder %s209_s24, %s342_s1 }
  0x2d   :  { %p215_p1 = pnand %p213_p0, %p210_p13 }
  0x2f   :  { %218 = shalt.err (!%p215_p1)
}
  0x30   :  { %165 = dma.vmem_to_hbm [thread:$0]  %s160_s20, 4096, %s342_s1, [#allocation4], %s224_s16, %s224_s16, %s225_s17  }
  0x31   :  { %221 = dma.done.wait [#allocation4], 4096  }
  0x32   :  { %222 = vsyncadd [#allocation4], 4294963200 }
  0x33   :  { %169 = vsyncpa [#allocation3], 1 }
  0x34   :  { %170 = vsyncpa [#allocation4], 1 }

// kernel: _stem_apply.1
= control target key start
LH: loop header
LB: loop body
LE: loop exit
PB: predicated region body
PF: predicated region fallthrough
CT: control target
= control target key end

     0   :  { %10 = vsyncpa [#allocation3], 0  ;;  %s2333_s0 = inlined_call_operand.vmem [shape: bf16[512,128], index: 0, kind: input, shape index: {}]   ;;  %s2334_s1 = inlined_call_operand.vmem [shape: bf16[128,128], index: 1, kind: input, shape index: {}]   ;;  %s2335_s2 = inlined_call_operand.vmem [shape: f32[1,128], index: 2, kind: input, shape index: {}]   ;;  %s2336_s3 = inlined_call_operand.vmem [shape: f32[1,128], index: 3, kind: input, shape index: {}]   ;;  %s2337_s4 = inlined_call_operand.vmem [shape: f32[1,128], index: 4, kind: input, shape index: {}]   ;;  %s2338_s5 = inlined_call_operand.hbm [shape: bf16[512,128], index: 5, kind: output, shape index: {}]  }
   0x1   :  { %12 = vsyncpa [#allocation3 + $0x1], 0  ;;  %s1767_s18 = smov 0   ;;  %s1769_s19 = smov 0  }
   0x2   :  { %s1771_s20 = smov 0   ;;  %s1773_s21 = smov 0  }
   0x3 LB: > { %s1788_s22 = sadd.s32 4294967295, %s1732_s21   ;;  %s1254_s23 = sadd.s32 4294967294, %s1732_s21   ;;  %s1732_s21 = sphi %s1773_s21, %s2344_s21   ;;  %s1728_s20 = sphi %s1771_s20, %s2343_s20   ;;  %s1724_s19 = sphi %s1769_s19, %s2342_s19   ;;  %s1720_s18 = sphi %s1767_s18, %s2341_s18  }
   0x4   : > { %s1792_s24 = sadd.s32 1, %s1732_s21   ;;  %s135_s25 = sadd.s32 1, %s1728_s20 }
   0x5   : > { %s132_s26 = ssub.s32 %s1732_s21, %s1792_s24  ;;  %p145_p0 = scmp.ne.s32.totalorder %s1728_s20, %s1724_s19 }
   0x6   : > { %p133_p1 = scmp.eq.s32.totalorder %s132_s26, 0  ;;  %p146_p2 = scmp.eq.s32.totalorder %s1788_s22, 1 }
   0x7   : > { %p151_p3 = scmp.ne.s32.totalorder %s1724_s19, %s1720_s18  ;;  %p152_p4 = scmp.eq.s32.totalorder %s1254_s23, 1 }
   0x8   : > { %s1803_s27 = scalar_select %p133_p1, %s1728_s20, %s135_s25  }
   0x9   : > { %p1805_p5 = por %p146_p2, %p145_p0  ;;  %p1809_p6 = por %p152_p4, %p151_p3 }
   0xa   : > { %p1257_p7 = scmp.ge.s32.totalorder %s1732_s21, 1  ;;  %p191_p8 = scmp.lt.s32.totalorder %s1732_s21, 3 }
   0xc   : > { %p192_p9 = pnand %p1257_p7, %p191_p8 }
   0xd   : > { %v1582_v0 = vld [vmem:[%s2334_s1] sm:$0xff] (!%p192_p9)   ;;  %s1259_s7 = sshll.u32 (!%p192_p9), %s1788_s22, 5  ;;  %v1583_v1 = vld [vmem:[%s2334_s1 + $0x8] sm:$0xff] (!%p192_p9)   ;;  %v1584_v2 = vld [vmem:[%s2334_s1 + $0x10] sm:$0xff] (!%p192_p9)   ;;  %s216_s14 = sand.u32 (!%p192_p9), 1, %s1724_s19  }
   0xe   : > { %195 = sbr.rel (%p192_p9) target bundleno = 652 (0x28c), region = 40  ;;  %p220_p10 = scmp.lt.s32.totalorder (!%p192_p9), %s1259_s7, 63  ;;  %1477 = vmatprep.subr.bf16.mxu0 (!%p192_p9), %v1582_v0  ;;  %1525 = vmatprep.subr.bf16.mxu1 (!%p192_p9), %v1582_v0  ;;  %v1585_v3 = vld [vmem:[%s2334_s1 + $0x18] sm:$0xff] (!%p192_p9)   ;;  %v1586_v6 = vld [vmem:[%s2334_s1 + $0x20] sm:$0xff] (!%p192_p9)   ;;  %v1587_v7 = vld [vmem:[%s2334_s1 + $0x28] sm:$0xff] (!%p192_p9)  }
   0xf   : > { %1478 = vmatpush3.bf16.msra.mxu0 (!%p192_p9), %v1582_v0  ;;  %1533 = vmatpush3.bf16.msra.mxu1 (!%p192_p9), %v1582_v0  ;;  %v1588_v8 = vld [vmem:[%s2334_s1 + $0x30] sm:$0xff] (!%p192_p9)   ;;  %v1589_v9 = vld [vmem:[%s2334_s1 + $0x38] sm:$0xff] (!%p192_p9)   ;;  %v1864_v24 = vld [vmem:[%s2335_s2] ss:$0 sm:$0xff] (!%p192_p9)  ;;  %s1258_s17 = sshll.u32 (!%p192_p9), %s216_s14, 7  ;;  %s1357_s25 = sshll.u32 (!%p192_p9), %s1788_s22, 11 }
  0x10   : > { %1479 = vmatprep.subr.bf16.mxu0 (!%p192_p9), %v1583_v1  ;;  %1526 = vmatprep.subr.bf16.mxu1 (!%p192_p9), %v1583_v1  ;;  %s2179_s23 = scalar_lea.vmem (!%p192_p9), [#allocation2], %s1258_s17  ;;  %s2292_s22 = scalar_lea.sflag (!%p192_p9), [#allocation3], %s216_s14 }
  0x11   : > { %s1192_s26 = sshll.u32 (!%p192_p9), %s2179_s23, 4  ;;  %s1734_s9 = smov (!%p192_p9), [#allocation2]   ;;  %s2287_s26 = int_to_ptr.vmem [resolvable:$true] %s1192_s26 }
  0x12   : > { %s1670_s8 = scalar_lea.vmem (!%p192_p9), %s2287_s26, 2048  ;;  %s1674_s10 = sshll.u32 (!%p192_p9), %s1734_s9, 4  ;;  %s1675_s10 = int_to_ptr.vmem [resolvable:$false] %s1674_s10 }
  0x13   : > { %1480 = vmatpush3.bf16.msra.mxu0 (!%p192_p9), %v1583_v1  ;;  %1534 = vmatpush3.bf16.msra.mxu1 (!%p192_p9), %v1583_v1  ;;  %p1671_p11 = scmp.ne.s32.totalorder (!%p192_p9), %s2287_s26, %s1670_s8  ;;  %s1676_s11 = scalar_lea.vmem (!%p192_p9), %s1675_s10, 4096 }
  0x14   : > { %1481 = vmatprep.subr.bf16.mxu0 (!%p192_p9), %v1584_v2  ;;  %1527 = vmatprep.subr.bf16.mxu1 (!%p192_p9), %v1584_v2  ;;  %p1677_p0 = scmp.lt.s32.totalorder (!%p192_p9), %s2287_s26, %s1675_s10  ;;  %p1678_p1 = scmp.lt.s32.totalorder (!%p192_p9), %s1676_s11, %s1670_s8 }
  0x15   : > { %s2346_s7 = smov (!%p220_p10, %s1259_s7), 63  ;;  %p1672_p12 = pnand %p1671_p11, %p1805_p5 }
  0x16   : > { %s1260_s12 = sshll.u32 %s2346_s7, 2  ;;  %s2285_s7 = scalar_lea.hbm %s2338_s5, %s1357_s25 }
  0x17   : > { %s1828_s15 = scalar_lea.vmem %s2333_s0, %s1260_s12  ;;  %1482 = vmatpush3.bf16.msra.mxu0 %v1584_v2  ;;  %1535 = vmatpush3.bf16.msra.mxu1 %v1584_v2  ;;  %p1673_p13 = pneg %p1672_p12 }
  0x18   : > { %v1590_v4 = vld [vmem:[%s1828_s15] sm:$0xff]   ;;  %1483 = vmatprep.subr.bf16.mxu0 %v1585_v3  ;;  %1528 = vmatprep.subr.bf16.mxu1 %v1585_v3  ;;  %v1592_v10 = vld [vmem:[%s1828_s15 + $0x8] sm:$0xff]   ;;  %v1594_v12 = vld [vmem:[%s1828_s15 + $0x10] sm:$0xff]   ;;  %p1679_p2 = por %p1678_p1, %p1677_p0 }
  0x19   : > { %v1591_v5 = vld [vmem:[%s1828_s15 + $0x40] sm:$0xff]   ;;  %1493 = vmatprep.mubr.bf16.mxu0 %v1590_v4  ;;  %v1593_v11 = vld [vmem:[%s1828_s15 + $0x48] sm:$0xff]   ;;  %v1596_v13 = vld [vmem:[%s1828_s15 + $0x50] sm:$0xff]  }
  0x1a   : > { %1509 = vmatprep.mubr.bf16.mxu1 %v1591_v5  ;;  %v1595_v14 = vld [vmem:[%s1828_s15 + $0x18] sm:$0xff]   ;;  %v1598_v16 = vld [vmem:[%s1828_s15 + $0x20] sm:$0xff]   ;;  %v1599_v18 = vld [vmem:[%s1828_s15 + $0x28] sm:$0xff]   ;;  %p1680_p3 = pnand %p1679_p2, %p1673_p13 }
  0x1b   : > { %1484 = vmatpush3.bf16.msra.mxu0 %v1585_v3  ;;  %1536 = vmatpush3.bf16.msra.mxu1 %v1585_v3  ;;  %v1597_v15 = vld [vmem:[%s1828_s15 + $0x58] sm:$0xff]   ;;  %v1600_v17 = vld [vmem:[%s1828_s15 + $0x60] sm:$0xff]   ;;  %v1601_v19 = vld [vmem:[%s1828_s15 + $0x68] sm:$0xff]  }
  0x1c   : > { %1485 = vmatprep.subr.bf16.mxu0 %v1586_v6  ;;  %1529 = vmatprep.subr.bf16.mxu1 %v1586_v6  ;;  %v1602_v20 = vld [vmem:[%s1828_s15 + $0x30] sm:$0xff]   ;;  %v1603_v22 = vld [vmem:[%s1828_s15 + $0x38] sm:$0xff]  }
  0x1d   : > { %v1604_v21 = vld [vmem:[%s1828_s15 + $0x70] sm:$0xff]   ;;  %v1605_v23 = vld [vmem:[%s1828_s15 + $0x78] sm:$0xff]  }
  0x1f   : > { %1486 = vmatpush3.bf16.msra.mxu0 %v1586_v6  ;;  %1537 = vmatpush3.bf16.msra.mxu1 %v1586_v6 }
  0x20   : > { %1487 = vmatprep.subr.bf16.mxu0 %v1587_v7  ;;  %1530 = vmatprep.subr.bf16.mxu1 %v1587_v7 }
  0x23   : > { %1488 = vmatpush3.bf16.msra.mxu0 %v1587_v7  ;;  %1538 = vmatpush3.bf16.msra.mxu1 %v1587_v7 }
  0x24   : > { %1489 = vmatprep.subr.bf16.mxu0 %v1588_v8  ;;  %1531 = vmatprep.subr.bf16.mxu1 %v1588_v8 }
  0x27   : > { %1490 = vmatpush3.bf16.msra.mxu0 %v1588_v8  ;;  %1539 = vmatpush3.bf16.msra.mxu1 %v1588_v8 }
  0x28   : > { %1491 = vmatprep.subr.bf16.mxu0 %v1589_v9  ;;  %1532 = vmatprep.subr.bf16.mxu1 %v1589_v9 }
  0x2b   : > { %1492 = vmatpush3.bf16.msra.mxu0 %v1589_v9  ;;  %1540 = vmatpush3.bf16.msra.mxu1 %v1589_v9 }
  0x2e   : > { %1494 = vmatmul.mubr.bf16.vlgmr.msra.gmra.mrb[0].mxu0 %v1592_v10  ;;  %1510 = vmatmul.mubr.bf16.vlgmr.msra.gmra.mrb[0].mxu1 %v1593_v11 }
  0x2f   : > { %1497 = vmatprep.mubr.bf16.mxu0 %v1594_v12  ;;  %1513 = vmatprep.mubr.bf16.mxu1 %v1596_v13 }
  0x36   : > { %1498 = vmatmul.mubr.bf16.gmra.mrb[4].mxu0 %v1595_v14  ;;  %1514 = vmatmul.mubr.bf16.gmra.mrb[4].mxu1 %v1597_v15 }
  0x37   : > { %1501 = vmatprep.mubr.bf16.mxu0 %v1598_v16  ;;  %1517 = vmatprep.mubr.bf16.mxu1 %v1600_v17 }
  0x3e   : > { %1502 = vmatmul.mubr.bf16.gmra.mrb[8].mxu0 %v1599_v18  ;;  %1518 = vmatmul.mubr.bf16.gmra.mrb[8].mxu1 %v1601_v19 }
  0x3f   : > { %1505 = vmatprep.mubr.bf16.mxu0 %v1602_v20  ;;  %1521 = vmatprep.mubr.bf16.mxu1 %v1604_v21 }
  0x46   : > { %1506 = vmatmul.mubr.bf16.gmra.mrb[12].mxu0 %v1603_v22  ;;  %1522 = vmatmul.mubr.bf16.gmra.mrb[12].mxu1 %v1605_v23 }
 0x101   : > { %v1495_v25 = vpop.f32.mrb[0].mxu0  ;;  %v1511_v26 = vpop.f32.mrb[0].mxu1 }
 0x102   : > { %v1867_v27 = vadd.f32 %v1495_v25, %v1864_v24  ;;  %v1870_v28 = vadd.f32 %v1511_v26, %v1864_v24  ;;  %v460_v29 = vpop.f32.mrb[1].mxu0  ;;  %v524_v30 = vpop.f32.mrb[1].mxu1 }
 0x103   : > { %v1496_v31 = vpop.f32.mrb[2].mxu0  ;;  %v1512_v32 = vpop.f32.mrb[2].mxu1  ;;  %v1875_v35 = vadd.f32 %v1864_v24, %v460_v29  ;;  %v1883_v39 = vadd.f32 %v1864_v24, %v524_v30 }
 0x104   : > { %625 = vadd.xlane.f32.xlu0 %v1870_v28  ;;  %v527_v33 = vpop.f32.mrb[3].mxu1  ;;  %593 = vadd.xlane.f32.xlu1 %v1867_v27  ;;  %v463_v34 = vpop.f32.mrb[3].mxu0  ;;  %v1878_v36 = vadd.f32 %v1496_v31, %v1864_v24  ;;  %v1886_v40 = vadd.f32 %v1512_v32, %v1864_v24 }
 0x105   : > { %v1891_v47 = vadd.f32 %v1864_v24, %v527_v33  ;;  %v1894_v48 = vadd.f32 %v1864_v24, %v463_v34 }
 0x108   : > { %595 = vadd.xlane.f32.xlu1 %v1878_v36  ;;  %589 = vadd.xlane.f32.xlu0 %v1875_v35 }
 0x109   : > { %v1499_v37 = vpop.f32.mrb[4].mxu0  ;;  %v1515_v38 = vpop.f32.mrb[4].mxu1 }
 0x10a   : > { %v476_v41 = vpop.f32.mrb[5].mxu0  ;;  %v540_v42 = vpop.f32.mrb[5].mxu1  ;;  %v1897_v49 = vadd.f32 %v1499_v37, %v1864_v24  ;;  %v1905_v57 = vadd.f32 %v1515_v38, %v1864_v24 }
 0x10b   : > { %v1500_v43 = vpop.f32.mrb[6].mxu0  ;;  %v1516_v44 = vpop.f32.mrb[6].mxu1  ;;  %v1915_v63 = vadd.f32 %v1864_v24, %v476_v41  ;;  %v1923_v7 = vadd.f32 %v1864_v24, %v540_v42 }
 0x10c   : > { %627 = vadd.xlane.f32.xlu1 %v1886_v40  ;;  %621 = vadd.xlane.f32.xlu0 %v1883_v39  ;;  %v479_v45 = vpop.f32.mrb[7].mxu0  ;;  %v543_v46 = vpop.f32.mrb[7].mxu1  ;;  %v1902_v50 = vadd.f32 %v1500_v43, %v1864_v24  ;;  %v1910_v58 = vadd.f32 %v1516_v44, %v1864_v24 }
 0x10d   : > { %v1918_v0 = vadd.f32 %v1864_v24, %v479_v45  ;;  %v1926_v8 = vadd.f32 %v1864_v24, %v543_v46 }
 0x110   : > { %623 = vadd.xlane.f32.xlu1 %v1891_v47  ;;  %591 = vadd.xlane.f32.xlu0 %v1894_v48 }
 0x111   : > { %v1503_v51 = vpop.f32.mrb[8].mxu0  ;;  %v1519_v52 = vpop.f32.mrb[8].mxu1 }
 0x112   : > { %v492_v53 = vpop.f32.mrb[9].mxu0  ;;  %v556_v54 = vpop.f32.mrb[9].mxu1  ;;  %v1929_v9 = vadd.f32 %v1503_v51, %v1864_v24  ;;  %v1937_v11 = vadd.f32 %v1519_v52, %v1864_v24 }
 0x113   : > { %v1504_v55 = vpop.f32.mrb[10].mxu0  ;;  %v1520_v56 = vpop.f32.mrb[10].mxu1  ;;  %v1947_v13 = vadd.f32 %v1864_v24, %v492_v53  ;;  %v1955_v15 = vadd.f32 %v1864_v24, %v556_v54 }
 0x114   : > { %603 = vadd.xlane.f32.xlu1 %v1902_v50  ;;  %601 = vadd.xlane.f32.xlu0 %v1897_v49  ;;  %v495_v59 = vpop.f32.mrb[11].mxu0  ;;  %v559_v60 = vpop.f32.mrb[11].mxu1  ;;  %v1934_v10 = vadd.f32 %v1504_v55, %v1864_v24  ;;  %v1942_v12 = vadd.f32 %v1520_v56, %v1864_v24 }
 0x115   : > { %v1950_v14 = vadd.f32 %v1864_v24, %v495_v59  ;;  %v1958_v16 = vadd.f32 %v1864_v24, %v559_v60 }
 0x118   : > { %635 = vadd.xlane.f32.xlu1 %v1910_v58  ;;  %633 = vadd.xlane.f32.xlu0 %v1905_v57 }
 0x119   : > { %v1507_v61 = vpop.f32.mrb[12].mxu0  ;;  %v1523_v62 = vpop.f32.mrb[12].mxu1 }
 0x11a   : > { %v508_v1 = vpop.f32.mrb[13].mxu0  ;;  %v572_v2 = vpop.f32.mrb[13].mxu1  ;;  %v1961_v17 = vadd.f32 %v1507_v61, %v1864_v24  ;;  %v1987_v23 = vadd.f32 %v1523_v62, %v1864_v24 }
 0x11b   : > { %v1508_v3 = vpop.f32.mrb[14].mxu0  ;;  %v1524_v4 = vpop.f32.mrb[14].mxu1  ;;  %v1971_v19 = vadd.f32 %v1864_v24, %v508_v1  ;;  %v1977_v21 = vadd.f32 %v1864_v24, %v572_v2 }
 0x11c   : > { %599 = vadd.xlane.f32.xlu1 %v1918_v0  ;;  %597 = vadd.xlane.f32.xlu0 %v1915_v63  ;;  %v511_v5 = vpop.f32.mrb[15].mxu0  ;;  %v575_v6 = vpop.f32.mrb[15].mxu1  ;;  %v1966_v18 = vadd.f32 %v1508_v3, %v1864_v24  ;;  %v1990_v25 = vadd.f32 %v1524_v4, %v1864_v24 }
 0x11d   : > { %v1974_v20 = vadd.f32 %v1864_v24, %v511_v5  ;;  %v1982_v22 = vadd.f32 %v1864_v24, %v575_v6 }
 0x120   : > { %631 = vadd.xlane.f32.xlu1 %v1926_v8  ;;  %629 = vadd.xlane.f32.xlu0 %v1923_v7 }
 0x124   : > { %611 = vadd.xlane.f32.xlu1 %v1934_v10  ;;  %609 = vadd.xlane.f32.xlu0 %v1929_v9 }
 0x128   : > { %643 = vadd.xlane.f32.xlu1 %v1942_v12  ;;  %641 = vadd.xlane.f32.xlu0 %v1937_v11 }
 0x12c   : > { %607 = vadd.xlane.f32.xlu1 %v1950_v14  ;;  %605 = vadd.xlane.f32.xlu0 %v1947_v13 }
 0x130   : > { %639 = vadd.xlane.f32.xlu1 %v1958_v16  ;;  %637 = vadd.xlane.f32.xlu0 %v1955_v15 }
 0x134   : > { %619 = vadd.xlane.f32.xlu1 %v1966_v18  ;;  %617 = vadd.xlane.f32.xlu0 %v1961_v17 }
 0x138   : > { %615 = vadd.xlane.f32.xlu1 %v1974_v20  ;;  %613 = vadd.xlane.f32.xlu0 %v1971_v19 }
 0x13c   : > { %647 = vadd.xlane.f32.xlu1 %v1982_v22  ;;  %645 = vadd.xlane.f32.xlu0 %v1977_v21 }
 0x140   : > { %651 = vadd.xlane.f32.xlu1 %v1990_v25  ;;  %649 = vadd.xlane.f32.xlu0 %v1987_v23 }
 0x191   : > { %v626_v26 = vpop.xlane.xlu0 %625  ;;  %v594_v29 = vpop.xlane.xlu1 %593 }
 0x192   : > { %v672_v30 = vmul.f32 0.0078125, %v626_v26  ;;  %v656_v31 = vmul.f32 0.0078125, %v594_v29 }
 0x194   : > { %v1995_v32 = vsub.f32 %v1867_v27, %v656_v31  ;;  %v1998_v37 = vsub.f32 %v1870_v28, %v672_v30 }
 0x195   : > { %v596_v33 = vpop.xlane.xlu1 %595  ;;  %v590_v34 = vpop.xlane.xlu0 %589 }
 0x196   : > { %v657_v38 = vmul.f32 0.0078125, %v596_v33  ;;  %v654_v41 = vmul.f32 0.0078125, %v590_v34  ;;  %v720_v24 = vmul.f32 %v1995_v32, %v1995_v32  ;;  %v736_v51 = vmul.f32 %v1998_v37, %v1998_v37 }
 0x198   : > { %v2003_v42 = vsub.f32 %v1878_v36, %v657_v38  ;;  %754 = vadd.xlane.f32.xlu0 %v720_v24  ;;  %v2006_v43 = vsub.f32 %v1875_v35, %v654_v41 }
 0x199   : > { %v628_v44 = vpop.xlane.xlu1 %627  ;;  %v622_v27 = vpop.xlane.xlu0 %621 }
 0x19a   : > { %v673_v45 = vmul.f32 0.0078125, %v628_v44  ;;  %v670_v46 = vmul.f32 0.0078125, %v622_v27  ;;  %v721_v28 = vmul.f32 %v2003_v42, %v2003_v42  ;;  %v718_v35 = vmul.f32 %v2006_v43, %v2006_v43 }
 0x19c   : > { %v2013_v52 = vsub.f32 %v1886_v40, %v673_v45  ;;  %756 = vadd.xlane.f32.xlu1 %v721_v28  ;;  %786 = vadd.xlane.f32.xlu0 %v736_v51  ;;  %v2018_v54 = vsub.f32 %v1883_v39, %v670_v46 }
 0x19d   : > { %v624_v36 = vpop.xlane.xlu1 %623  ;;  %v592_v53 = vpop.xlane.xlu0 %591 }
 0x19e   : > { %v671_v55 = vmul.f32 0.0078125, %v624_v36  ;;  %v655_v56 = vmul.f32 0.0078125, %v592_v53  ;;  %v737_v59 = vmul.f32 %v2013_v52, %v2013_v52  ;;  %v734_v39 = vmul.f32 %v2018_v54, %v2018_v54 }
 0x1a0   : > { %v2023_v60 = vsub.f32 %v1894_v48, %v655_v56  ;;  %788 = vadd.xlane.f32.xlu1 %v737_v59  ;;  %750 = vadd.xlane.f32.xlu0 %v718_v35  ;;  %v2026_v40 = vsub.f32 %v1891_v47, %v671_v55 }
 0x1a1   : > { %v604_v61 = vpop.xlane.xlu1 %603  ;;  %v602_v62 = vpop.xlane.xlu0 %601 }
 0x1a2   : > { %v661_v1 = vmul.f32 0.0078125, %v604_v61  ;;  %v660_v2 = vmul.f32 0.0078125, %v602_v62  ;;  %v719_v3 = vmul.f32 %v2023_v60, %v2023_v60  ;;  %v735_v47 = vmul.f32 %v2026_v40, %v2026_v40 }
 0x1a4   : > { %v2033_v4 = vsub.f32 %v1897_v49, %v660_v2  ;;  %782 = vadd.xlane.f32.xlu0 %v734_v39  ;;  %752 = vadd.xlane.f32.xlu1 %v719_v3  ;;  %v2038_v6 = vsub.f32 %v1902_v50, %v661_v1 }
 0x1a5   : > { %v636_v48 = vpop.xlane.xlu1 %635  ;;  %v634_v5 = vpop.xlane.xlu0 %633 }
 0x1a6   : > { %v677_v26 = vmul.f32 0.0078125, %v636_v48  ;;  %v676_v29 = vmul.f32 0.0078125, %v634_v5  ;;  %v724_v30 = vmul.f32 %v2033_v4, %v2033_v4  ;;  %v725_v50 = vmul.f32 %v2038_v6, %v2038_v6 }
 0x1a8   : > { %v2043_v31 = vsub.f32 %v1905_v57, %v676_v29  ;;  %784 = vadd.xlane.f32.xlu1 %v735_v47  ;;  %762 = vadd.xlane.f32.xlu0 %v724_v30  ;;  %v2046_v49 = vsub.f32 %v1910_v58, %v677_v26 }
 0x1a9   : > { %v600_v33 = vpop.xlane.xlu1 %599  ;;  %v598_v34 = vpop.xlane.xlu0 %597 }
 0x1aa   : > { %v659_v38 = vmul.f32 0.0078125, %v600_v33  ;;  %v658_v41 = vmul.f32 0.0078125, %v598_v34  ;;  %v740_v24 = vmul.f32 %v2043_v31, %v2043_v31  ;;  %v741_v58 = vmul.f32 %v2046_v49, %v2046_v49 }
 0x1ac   : > { %v2053_v44 = vsub.f32 %v1915_v63, %v658_v41  ;;  %764 = vadd.xlane.f32.xlu1 %v725_v50  ;;  %794 = vadd.xlane.f32.xlu0 %v740_v24  ;;  %v2058_v45 = vsub.f32 %v1918_v0, %v659_v38 }
 0x1ad   : > { %v632_v57 = vpop.xlane.xlu1 %631  ;;  %v630_v27 = vpop.xlane.xlu0 %629 }
 0x1ae   : > { %v675_v46 = vmul.f32 0.0078125, %v632_v57  ;;  %v674_v28 = vmul.f32 0.0078125, %v630_v27  ;;  %v722_v51 = vmul.f32 %v2053_v44, %v2053_v44  ;;  %v723_v0 = vmul.f32 %v2058_v45, %v2058_v45 }
 0x1b0   : > { %v2063_v36 = vsub.f32 %v1923_v7, %v674_v28  ;;  %796 = vadd.xlane.f32.xlu1 %v741_v58  ;;  %758 = vadd.xlane.f32.xlu0 %v722_v51  ;;  %v2066_v63 = vsub.f32 %v1926_v8, %v675_v46 }
 0x1b1   : > { %v612_v53 = vpop.xlane.xlu1 %611  ;;  %v610_v35 = vpop.xlane.xlu0 %609 }
 0x1b2   : > { %v665_v55 = vmul.f32 0.0078125, %v612_v53  ;;  %v664_v56 = vmul.f32 0.0078125, %v610_v35  ;;  %v738_v59 = vmul.f32 %v2063_v36, %v2063_v36  ;;  %v739_v8 = vmul.f32 %v2066_v63, %v2066_v63 }
 0x1b4   : > { %v2073_v61 = vsub.f32 %v1929_v9, %v664_v56  ;;  %760 = vadd.xlane.f32.xlu1 %v723_v0  ;;  %790 = vadd.xlane.f32.xlu0 %v738_v59  ;;  %v2078_v1 = vsub.f32 %v1934_v10, %v665_v55 }
 0x1b5   : > { %v644_v7 = vpop.xlane.xlu1 %643  ;;  %v642_v62 = vpop.xlane.xlu0 %641 }
 0x1b6   : > { %v681_v2 = vmul.f32 0.0078125, %v644_v7  ;;  %v680_v39 = vmul.f32 0.0078125, %v642_v62  ;;  %v728_v3 = vmul.f32 %v2073_v61, %v2073_v61  ;;  %v729_v10 = vmul.f32 %v2078_v1, %v2078_v1 }
 0x1b8   : > { %v2083_v48 = vsub.f32 %v1937_v11, %v680_v39  ;;  %792 = vadd.xlane.f32.xlu1 %v739_v8  ;;  %770 = vadd.xlane.f32.xlu0 %v728_v3  ;;  %v2086_v9 = vsub.f32 %v1942_v12, %v681_v2 }
 0x1b9   : > { %v608_v5 = vpop.xlane.xlu1 %607  ;;  %v606_v47 = vpop.xlane.xlu0 %605 }
 0x1ba   : > { %v663_v26 = vmul.f32 0.0078125, %v608_v5  ;;  %v662_v29 = vmul.f32 0.0078125, %v606_v47  ;;  %v744_v30 = vmul.f32 %v2083_v48, %v2083_v48  ;;  %v745_v12 = vmul.f32 %v2086_v9, %v2086_v9 }
 0x1bc   : > { %v2093_v33 = vsub.f32 %v1947_v13, %v662_v29  ;;  %772 = vadd.xlane.f32.xlu1 %v729_v10  ;;  %802 = vadd.xlane.f32.xlu0 %v744_v30  ;;  %v2098_v38 = vsub.f32 %v1950_v14, %v663_v26 }
 0x1bd   : > { %v640_v11 = vpop.xlane.xlu1 %639  ;;  %v638_v34 = vpop.xlane.xlu0 %637 }
 0x1be   : > { %v679_v41 = vmul.f32 0.0078125, %v640_v11  ;;  %v678_v50 = vmul.f32 0.0078125, %v638_v34  ;;  %v726_v24 = vmul.f32 %v2093_v33, %v2093_v33  ;;  %v727_v14 = vmul.f32 %v2098_v38, %v2098_v38 }
 0x1c0   : > { %v2103_v57 = vsub.f32 %v1955_v15, %v678_v50  ;;  %804 = vadd.xlane.f32.xlu1 %v745_v12  ;;  %766 = vadd.xlane.f32.xlu0 %v726_v24  ;;  %v2106_v13 = vsub.f32 %v1958_v16, %v679_v41 }
 0x1c1   : > { %v620_v27 = vpop.xlane.xlu1 %619  ;;  %v618_v58 = vpop.xlane.xlu0 %617 }
 0x1c2   : > { %v669_v46 = vmul.f32 0.0078125, %v620_v27  ;;  %v668_v28 = vmul.f32 0.0078125, %v618_v58  ;;  %v742_v51 = vmul.f32 %v2103_v57, %v2103_v57  ;;  %v743_v16 = vmul.f32 %v2106_v13, %v2106_v13 }
 0x1c4   : > { %v2113_v53 = vsub.f32 %v1961_v17, %v668_v28  ;;  %768 = vadd.xlane.f32.xlu1 %v727_v14  ;;  %798 = vadd.xlane.f32.xlu0 %v742_v51  ;;  %v2118_v55 = vsub.f32 %v1966_v18, %v669_v46 }
 0x1c5   : > { %v616_v15 = vpop.xlane.xlu1 %615  ;;  %v614_v35 = vpop.xlane.xlu0 %613 }
 0x1c6   : > { %v667_v56 = vmul.f32 0.0078125, %v616_v15  ;;  %v666_v0 = vmul.f32 0.0078125, %v614_v35  ;;  %v732_v59 = vmul.f32 %v2113_v53, %v2113_v53  ;;  %v733_v18 = vmul.f32 %v2118_v55, %v2118_v55 }
 0x1c8   : > { %v2123_v7 = vsub.f32 %v1971_v19, %v666_v0  ;;  %800 = vadd.xlane.f32.xlu1 %v743_v16  ;;  %778 = vadd.xlane.f32.xlu0 %v732_v59  ;;  %v2126_v17 = vsub.f32 %v1974_v20, %v667_v56 }
 0x1c9   : > { %v648_v62 = vpop.xlane.xlu1 %647  ;;  %v646_v8 = vpop.xlane.xlu0 %645 }
 0x1ca   : > { %v683_v2 = vmul.f32 0.0078125, %v648_v62  ;;  %v682_v39 = vmul.f32 0.0078125, %v646_v8  ;;  %v730_v3 = vmul.f32 %v2123_v7, %v2123_v7  ;;  %v731_v20 = vmul.f32 %v2126_v17, %v2126_v17 }
 0x1cc   : > { %v2133_v5 = vsub.f32 %v1977_v21, %v682_v39  ;;  %780 = vadd.xlane.f32.xlu1 %v733_v18  ;;  %774 = vadd.xlane.f32.xlu0 %v730_v3  ;;  %v2138_v26 = vsub.f32 %v1982_v22, %v683_v2 }
 0x1cd   : > { %v652_v19 = vpop.xlane.xlu1 %651  ;;  %v650_v47 = vpop.xlane.xlu0 %649 }
 0x1ce   : > { %v685_v29 = vmul.f32 0.0078125, %v652_v19  ;;  %v684_v10 = vmul.f32 0.0078125, %v650_v47  ;;  %v746_v30 = vmul.f32 %v2133_v5, %v2133_v5  ;;  %v747_v34 = vmul.f32 %v2138_v26, %v2138_v26 }
 0x1d0   : > { %v2143_v11 = vsub.f32 %v1987_v23, %v684_v10  ;;  %776 = vadd.xlane.f32.xlu1 %v731_v20  ;;  %806 = vadd.xlane.f32.xlu0 %v746_v30  ;;  %v2146_v21 = vsub.f32 %v1990_v25, %v685_v29  ;;  %v2158_v20 = vld [vmem:[%s2336_s3] ss:$0 sm:$0xff] }
 0x1d2   : > { %v748_v22 = vmul.f32 %v2143_v11, %v2143_v11  ;;  %v749_v12 = vmul.f32 %v2146_v21, %v2146_v21 }
 0x1d4   : > { %808 = vadd.xlane.f32.xlu1 %v747_v34  ;;  %810 = vadd.xlane.f32.xlu0 %v748_v22 }
 0x1d8   : > { %812 = vadd.xlane.f32.xlu1 %v749_v12 }
 0x225   : > { %v755_v41 = vpop.xlane.xlu0 %754 }
 0x226   : > { %v816_v23 = vmul.f32 0.0078125, %v755_v41 }
 0x228   : > { %v848_v50 = vadd.f32 1e-06, %v816_v23 }
 0x229   : > { %v757_v24 = vpop.xlane.xlu1 %756  ;;  %v787_v27 = vpop.xlane.xlu0 %786 }
 0x22a   : > { %1606 = vrsqrt.f32 %v848_v50  ;;  %v817_v25 = vmul.f32 0.0078125, %v757_v24  ;;  %v832_v58 = vmul.f32 0.0078125, %v787_v27  ;;  %v2166_v24 = vld [vmem:[%s2337_s4] ss:$0 sm:$0xff] }
 0x22c   : > { %v849_v46 = vadd.f32 1e-06, %v817_v25  ;;  %v864_v28 = vadd.f32 1e-06, %v832_v58 }
 0x22d   : > { %v789_v14 = vpop.xlane.xlu1 %788  ;;  %v751_v51 = vpop.xlane.xlu0 %750 }
 0x22e   : > { %1608 = vrsqrt.f32 %v849_v46  ;;  %v833_v15 = vmul.f32 0.0078125, %v789_v14  ;;  %v814_v35 = vmul.f32 0.0078125, %v751_v51 }
 0x22f   : > { %1610 = vrsqrt.f32 %v864_v28 }
 0x230   : > { %v865_v16 = vadd.f32 1e-06, %v833_v15  ;;  %v846_v56 = vadd.f32 1e-06, %v814_v35 }
 0x231   : > { %v753_v0 = vpop.xlane.xlu1 %752  ;;  %v783_v59 = vpop.xlane.xlu0 %782 }
 0x232   : > { %1612 = vrsqrt.f32 %v865_v16  ;;  %v815_v62 = vmul.f32 0.0078125, %v753_v0  ;;  %v830_v8 = vmul.f32 0.0078125, %v783_v59 }
 0x233   : > { %1614 = vrsqrt.f32 %v846_v56 }
 0x234   : > { %v1607_v2 = vpop.eup %1606  ;;  %v847_v39 = vadd.f32 1e-06, %v815_v62  ;;  %v862_v18 = vadd.f32 1e-06, %v830_v8 }
 0x235   : > { %v912_v3 = vmul.f32 %v1607_v2, %v1995_v32  ;;  %v785_v19 = vpop.xlane.xlu1 %784  ;;  %v763_v47 = vpop.xlane.xlu0 %762 }
 0x236   : > { %1616 = vrsqrt.f32 %v847_v39  ;;  %v831_v29 = vmul.f32 0.0078125, %v785_v19  ;;  %v820_v10 = vmul.f32 0.0078125, %v763_v47 }
 0x237   : > { %1618 = vrsqrt.f32 %v862_v18  ;;  %v950_v41 = vmul.f32 %v2158_v20, %v912_v3 }
 0x238   : > { %v1609_v30 = vpop.eup %1608  ;;  %v863_v34 = vadd.f32 1e-06, %v831_v29  ;;  %v852_v22 = vadd.f32 1e-06, %v820_v10 }
 0x239   : > { %v1611_v12 = vpop.eup %1610  ;;  %v913_v32 = vmul.f32 %v1609_v30, %v2003_v42  ;;  %v765_v23 = vpop.xlane.xlu1 %764  ;;  %v988_v15 = vadd.f32 %v2166_v24, %v950_v41 }
 0x23a   : > { %v795_v50 = vpop.xlane.xlu0 %794  ;;  %v928_v27 = vmul.f32 %v1611_v12, %v1998_v37  ;;  %1620 = vrsqrt.f32 %v863_v34  ;;  %v821_v25 = vmul.f32 0.0078125, %v765_v23 }
 0x23b   : > { %v836_v58 = vmul.f32 0.0078125, %v795_v50  ;;  %v951_v46 = vmul.f32 %v2158_v20, %v913_v32  ;;  %1622 = vrsqrt.f32 %v852_v22 }
 0x23c   : > { %v1613_v28 = vpop.eup %1612  ;;  %v853_v14 = vadd.f32 1e-06, %v821_v25  ;;  %v966_v16 = vmul.f32 %v2158_v20, %v928_v27 }
 0x23d   : > { %v868_v42 = vadd.f32 1e-06, %v836_v58  ;;  %v1615_v51 = vpop.eup %1614  ;;  %v989_v35 = vadd.f32 %v2166_v24, %v951_v46  ;;  %v929_v37 = vmul.f32 %v1613_v28, %v2013_v52  ;;  %v797_v56 = vpop.xlane.xlu1 %796 }
 0x23e   : > { %v759_v0 = vpop.xlane.xlu0 %758  ;;  %v910_v59 = vmul.f32 %v1615_v51, %v2006_v43  ;;  %1624 = vrsqrt.f32 %v853_v14  ;;  %v837_v62 = vmul.f32 0.0078125, %v797_v56  ;;  %v1004_v52 = vadd.f32 %v2166_v24, %v966_v16 }
 0x23f   : > { %v1366_v8 = vpack.c.bf16 %v989_v35, %v988_v15  ;;  %v967_v2 = vmul.f32 %v2158_v20, %v929_v37  ;;  %1626 = vrsqrt.f32 %v868_v42  ;;  %v818_v39 = vmul.f32 0.0078125, %v759_v0 }
 0x240   : > { %v1617_v18 = vpop.eup %1616  ;;  %v948_v3 = vmul.f32 %v2158_v20, %v910_v59  ;;  %v869_v19 = vadd.f32 1e-06, %v837_v62 }
 0x241   : > { %v1619_v47 = vpop.eup %1618  ;;  %1438 = vst [vmem:[%s2179_s23 + $0x8] sm:$0xff] %v1366_v8   ;;  %v1005_v43 = vadd.f32 %v2166_v24, %v967_v2  ;;  %v911_v29 = vmul.f32 %v1617_v18, %v2023_v60  ;;  %v850_v10 = vadd.f32 1e-06, %v818_v39  ;;  %v761_v30 = vpop.xlane.xlu1 %760 }
 0x242   : > { %v791_v34 = vpop.xlane.xlu0 %790  ;;  %v926_v22 = vmul.f32 %v1619_v47, %v2018_v54  ;;  %1628 = vrsqrt.f32 %v869_v19  ;;  %v819_v12 = vmul.f32 0.0078125, %v761_v30  ;;  %v986_v27 = vadd.f32 %v2166_v24, %v948_v3 }
 0x243   : > { %v1406_v41 = vpack.c.bf16 %v1005_v43, %v1004_v52  ;;  %v949_v32 = vmul.f32 %v2158_v20, %v911_v29  ;;  %1630 = vrsqrt.f32 %v850_v10  ;;  %v834_v23 = vmul.f32 0.0078125, %v791_v34 }
 0x244   : > { %v1621_v50 = vpop.eup %1620  ;;  %v851_v25 = vadd.f32 1e-06, %v819_v12  ;;  %v964_v46 = vmul.f32 %v2158_v20, %v926_v22 }
 0x245   : > { %v1623_v58 = vpop.eup %1622  ;;  %1446 = vst [vmem:[%s2179_s23 + $0x48] sm:$0xff] %v1406_v41   ;;  %v987_v60 = vadd.f32 %v2166_v24, %v949_v32  ;;  %v927_v54 = vmul.f32 %v1621_v50, %v2026_v40  ;;  %v866_v28 = vadd.f32 1e-06, %v834_v23  ;;  %v793_v14 = vpop.xlane.xlu1 %792 }
 0x246   : > { %v771_v42 = vpop.xlane.xlu0 %770  ;;  %v916_v51 = vmul.f32 %v1623_v58, %v2033_v4  ;;  %1632 = vrsqrt.f32 %v851_v25  ;;  %v835_v15 = vmul.f32 0.0078125, %v793_v14  ;;  %v1002_v40 = vadd.f32 %v2166_v24, %v964_v46 }
 0x247   : > { %v1361_v35 = vpack.c.bf16 %v987_v60, %v986_v27  ;;  %v965_v16 = vmul.f32 %v2158_v20, %v927_v54  ;;  %1634 = vrsqrt.f32 %v866_v28  ;;  %v824_v37 = vmul.f32 0.0078125, %v771_v42 }
 0x248   : > { %v1625_v56 = vpop.eup %1624  ;;  %v954_v0 = vmul.f32 %v2158_v20, %v916_v51  ;;  %v867_v59 = vadd.f32 1e-06, %v835_v15 }
 0x249   : > { %v1627_v62 = vpop.eup %1626  ;;  %1362 = vst [vmem:[%s2179_s23] sm:$0xff] %v1361_v35   ;;  %v1003_v8 = vadd.f32 %v2166_v24, %v965_v16  ;;  %v917_v4 = vmul.f32 %v1625_v56, %v2038_v6  ;;  %v856_v2 = vadd.f32 1e-06, %v824_v37  ;;  %v773_v39 = vpop.xlane.xlu1 %772 }
 0x24a   : > { %v803_v18 = vpop.xlane.xlu0 %802  ;;  %v932_v3 = vmul.f32 %v1627_v62, %v2043_v31  ;;  %1636 = vrsqrt.f32 %v867_v59  ;;  %v825_v19 = vmul.f32 0.0078125, %v773_v39  ;;  %v992_v10 = vadd.f32 %v2166_v24, %v954_v0 }
 0x24b   : > { %v1401_v47 = vpack.c.bf16 %v1003_v8, %v1002_v40  ;;  %v955_v52 = vmul.f32 %v2158_v20, %v917_v4  ;;  %1638 = vrsqrt.f32 %v856_v2  ;;  %v840_v43 = vmul.f32 0.0078125, %v803_v18 }
 0x24c   : > { %v1629_v29 = vpop.eup %1628  ;;  %v857_v30 = vadd.f32 1e-06, %v825_v19  ;;  %v970_v22 = vmul.f32 %v2158_v20, %v932_v3 }
 0x24d   : > { %v1631_v34 = vpop.eup %1630  ;;  %1445 = vst [vmem:[%s2179_s23 + $0x40] sm:$0xff] %v1401_v47   ;;  %v993_v6 = vadd.f32 %v2166_v24, %v955_v52  ;;  %v933_v31 = vmul.f32 %v1629_v29, %v2046_v49  ;;  %v872_v12 = vadd.f32 1e-06, %v840_v43  ;;  %v805_v41 = vpop.xlane.xlu1 %804 }
 0x24e   : > { %v767_v32 = vpop.xlane.xlu0 %766  ;;  %v914_v23 = vmul.f32 %v1631_v34, %v2053_v44  ;;  %1640 = vrsqrt.f32 %v857_v30  ;;  %v841_v50 = vmul.f32 0.0078125, %v805_v41  ;;  %v1008_v49 = vadd.f32 %v2166_v24, %v970_v22 }
 0x24f   : > { %v1376_v27 = vpack.c.bf16 %v993_v6, %v992_v10  ;;  %v971_v25 = vmul.f32 %v2158_v20, %v933_v31  ;;  %1642 = vrsqrt.f32 %v872_v12  ;;  %v822_v58 = vmul.f32 0.0078125, %v767_v32 }
 0x250   : > { %v1633_v60 = vpop.eup %1632  ;;  %v952_v46 = vmul.f32 %v2158_v20, %v914_v23  ;;  %v873_v54 = vadd.f32 1e-06, %v841_v50 }
 0x251   : > { %v1635_v28 = vpop.eup %1634  ;;  %1440 = vst [vmem:[%s2179_s23 + $0x18] sm:$0xff] %v1376_v27   ;;  %v1009_v14 = vadd.f32 %v2166_v24, %v971_v25  ;;  %v915_v44 = vmul.f32 %v1633_v60, %v2058_v45  ;;  %v854_v42 = vadd.f32 1e-06, %v822_v58  ;;  %v769_v51 = vpop.xlane.xlu1 %768 }
 0x252   : > { %v799_v15 = vpop.xlane.xlu0 %798  ;;  %v930_v35 = vmul.f32 %v1635_v28, %v2063_v36  ;;  %1644 = vrsqrt.f32 %v873_v54  ;;  %v823_v16 = vmul.f32 0.0078125, %v769_v51  ;;  %v990_v62 = vadd.f32 %v2166_v24, %v952_v46 }
 0x253   : > { %v1416_v37 = vpack.c.bf16 %v1009_v14, %v1008_v49  ;;  %v953_v56 = vmul.f32 %v2158_v20, %v915_v44  ;;  %1646 = vrsqrt.f32 %v854_v42  ;;  %v838_v0 = vmul.f32 0.0078125, %v799_v15 }
 0x254   : > { %v1637_v59 = vpop.eup %1636  ;;  %v855_v40 = vadd.f32 1e-06, %v823_v16  ;;  %v968_v4 = vmul.f32 %v2158_v20, %v930_v35 }
 0x255   : > { %v1639_v8 = vpop.eup %1638  ;;  %1448 = vst [vmem:[%s2179_s23 + $0x58] sm:$0xff] %v1416_v37   ;;  %v991_v45 = vadd.f32 %v2166_v24, %v953_v56  ;;  %v931_v36 = vmul.f32 %v1637_v59, %v2066_v63  ;;  %v870_v2 = vadd.f32 1e-06, %v838_v0  ;;  %v801_v39 = vpop.xlane.xlu1 %800 }
 0x256   : > { %v779_v18 = vpop.xlane.xlu0 %778  ;;  %v920_v3 = vmul.f32 %v1639_v8, %v2073_v61  ;;  %1648 = vrsqrt.f32 %v855_v40  ;;  %v839_v19 = vmul.f32 0.0078125, %v801_v39  ;;  %v1006_v63 = vadd.f32 %v2166_v24, %v968_v4 }
 0x257   : > { %v1371_v47 = vpack.c.bf16 %v991_v45, %v990_v62  ;;  %v969_v52 = vmul.f32 %v2158_v20, %v931_v36  ;;  %1650 = vrsqrt.f32 %v870_v2  ;;  %v828_v43 = vmul.f32 0.0078125, %v779_v18 }
 0x258   : > { %v1641_v29 = vpop.eup %1640  ;;  %v958_v10 = vmul.f32 %v2158_v20, %v920_v3  ;;  %v871_v30 = vadd.f32 1e-06, %v839_v19 }
 0x259   : > { %v1643_v34 = vpop.eup %1642  ;;  %1439 = vst [vmem:[%s2179_s23 + $0x10] sm:$0xff] %v1371_v47   ;;  %v1007_v6 = vadd.f32 %v2166_v24, %v969_v52  ;;  %v921_v61 = vmul.f32 %v1641_v29, %v2078_v1  ;;  %v860_v22 = vadd.f32 1e-06, %v828_v43  ;;  %v781_v31 = vpop.xlane.xlu1 %780 }
 0x25a   : > { %v775_v12 = vpop.xlane.xlu0 %774  ;;  %v936_v41 = vmul.f32 %v1643_v34, %v2083_v48  ;;  %1652 = vrsqrt.f32 %v871_v30  ;;  %v829_v32 = vmul.f32 0.0078125, %v781_v31  ;;  %v996_v58 = vadd.f32 %v2166_v24, %v958_v10 }
 0x25b   : > { %v1411_v23 = vpack.c.bf16 %v1007_v6, %v1006_v63  ;;  %v959_v50 = vmul.f32 %v2158_v20, %v921_v61  ;;  %1654 = vrsqrt.f32 %v860_v22  ;;  %v826_v27 = vmul.f32 0.0078125, %v775_v12 }
 0x25c   : > { %v1645_v25 = vpop.eup %1644  ;;  %v861_v60 = vadd.f32 1e-06, %v829_v32  ;;  %v974_v54 = vmul.f32 %v2158_v20, %v936_v41 }
 0x25d   : > { %v1647_v46 = vpop.eup %1646  ;;  %1447 = vst [vmem:[%s2179_s23 + $0x50] sm:$0xff] %v1411_v23   ;;  %v997_v1 = vadd.f32 %v2166_v24, %v959_v50  ;;  %v937_v48 = vmul.f32 %v1645_v25, %v2086_v9  ;;  %v858_v28 = vadd.f32 1e-06, %v826_v27  ;;  %v777_v49 = vpop.xlane.xlu1 %776 }
 0x25e   : > { %v807_v14 = vpop.xlane.xlu0 %806  ;;  %v918_v44 = vmul.f32 %v1647_v46, %v2093_v33  ;;  %1656 = vrsqrt.f32 %v861_v60  ;;  %v827_v42 = vmul.f32 0.0078125, %v777_v49  ;;  %v1012_v9 = vadd.f32 %v2166_v24, %v974_v54 }
 0x25f   : > { %v1386_v51 = vpack.c.bf16 %v997_v1, %v996_v58  ;;  %v975_v15 = vmul.f32 %v2158_v20, %v937_v48  ;;  %1658 = vrsqrt.f32 %v858_v28  ;;  %v842_v35 = vmul.f32 0.0078125, %v807_v14 }
 0x260   : > { %v1649_v16 = vpop.eup %1648  ;;  %v956_v37 = vmul.f32 %v2158_v20, %v918_v44  ;;  %v859_v56 = vadd.f32 1e-06, %v827_v42 }
 0x261   : > { %v1651_v0 = vpop.eup %1650  ;;  %1442 = vst [vmem:[%s2179_s23 + $0x28] sm:$0xff] %v1386_v51   ;;  %v1013_v59 = vadd.f32 %v2166_v24, %v975_v15  ;;  %v919_v33 = vmul.f32 %v1649_v16, %v2098_v38  ;;  %v874_v62 = vadd.f32 1e-06, %v842_v35  ;;  %v809_v40 = vpop.xlane.xlu1 %808 }
 0x262   : > { %v811_v8 = vpop.xlane.xlu0 %810  ;;  %v934_v45 = vmul.f32 %v1651_v0, %v2103_v57  ;;  %1660 = vrsqrt.f32 %v859_v56  ;;  %v843_v4 = vmul.f32 0.0078125, %v809_v40  ;;  %v994_v3 = vadd.f32 %v2166_v24, %v956_v37 }
 0x263   : > { %v1426_v36 = vpack.c.bf16 %v1013_v59, %v1012_v9  ;;  %v957_v2 = vmul.f32 %v2158_v20, %v919_v33  ;;  %1662 = vrsqrt.f32 %v874_v62  ;;  %v844_v39 = vmul.f32 0.0078125, %v811_v8 }
 0x264   : > { %v1653_v18 = vpop.eup %1652  ;;  %v875_v19 = vadd.f32 1e-06, %v843_v4  ;;  %v972_v52 = vmul.f32 %v2158_v20, %v934_v45 }
 0x265   : > { %v1655_v47 = vpop.eup %1654  ;;  %1450 = vst [vmem:[%s2179_s23 + $0x68] sm:$0xff] %v1426_v36   ;;  %v995_v38 = vadd.f32 %v2166_v24, %v957_v2  ;;  %v935_v57 = vmul.f32 %v1653_v18, %v2106_v13  ;;  %v876_v43 = vadd.f32 1e-06, %v844_v39  ;;  %v813_v29 = vpop.xlane.xlu1 %812 }
 0x266   : > { %v924_v10 = vmul.f32 %v1655_v47, %v2113_v53  ;;  %1664 = vrsqrt.f32 %v875_v19  ;;  %v845_v30 = vmul.f32 0.0078125, %v813_v29  ;;  %v1010_v31 = vadd.f32 %v2166_v24, %v972_v52 }
 0x267   : > { %v1381_v34 = vpack.c.bf16 %v995_v38, %v994_v3  ;;  %v973_v63 = vmul.f32 %v2158_v20, %v935_v57  ;;  %1666 = vrsqrt.f32 %v876_v43 }
 0x268   : > { %v1657_v6 = vpop.eup %1656  ;;  %v877_v61 = vadd.f32 1e-06, %v845_v30  ;;  %v962_v13 = vmul.f32 %v2158_v20, %v924_v10 }
 0x269   : > { %v1659_v22 = vpop.eup %1658  ;;  %1441 = vst [vmem:[%s2179_s23 + $0x20] sm:$0xff] %v1381_v34   ;;  %v1011_v12 = vadd.f32 %v2166_v24, %v973_v63  ;;  %v925_v41 = vmul.f32 %v1657_v6, %v2118_v55 }
 0x26a   : > { %v922_v53 = vmul.f32 %v1659_v22, %v2123_v7  ;;  %1668 = vrsqrt.f32 %v877_v61  ;;  %v1000_v25 = vadd.f32 %v2166_v24, %v962_v13 }
 0x26b   : > { %v1421_v32 = vpack.c.bf16 %v1011_v12, %v1010_v31  ;;  %v963_v23 = vmul.f32 %v2158_v20, %v925_v41 }
 0x26c   : > { %v1661_v50 = vpop.eup %1660  ;;  %v960_v60 = vmul.f32 %v2158_v20, %v922_v53 }
 0x26d   : > { %v1663_v27 = vpop.eup %1662  ;;  %1449 = vst [vmem:[%s2179_s23 + $0x60] sm:$0xff] %v1421_v32   ;;  %v1001_v58 = vadd.f32 %v2166_v24, %v963_v23  ;;  %v923_v46 = vmul.f32 %v1661_v50, %v2126_v17 }
 0x26e   : > { %v938_v55 = vmul.f32 %v1663_v27, %v2133_v5  ;;  %v998_v28 = vadd.f32 %v2166_v24, %v960_v60 }
 0x26f   : > { %v1396_v7 = vpack.c.bf16 %v1001_v58, %v1000_v25  ;;  %v961_v1 = vmul.f32 %v2158_v20, %v923_v46 }
 0x270   : > { %v1665_v54 = vpop.eup %1664  ;;  %v976_v14 = vmul.f32 %v2158_v20, %v938_v55 }
 0x271   : > { %v1667_v48 = vpop.eup %1666  ;;  %1444 = vst [vmem:[%s2179_s23 + $0x38] sm:$0xff] %v1396_v7   ;;  %v999_v49 = vadd.f32 %v2166_v24, %v961_v1  ;;  %v939_v44 = vmul.f32 %v1665_v54, %v2138_v26 }
 0x272   : > { %v940_v17 = vmul.f32 %v1667_v48, %v2143_v11  ;;  %v1014_v15 = vadd.f32 %v2166_v24, %v976_v14 }
 0x273   : > { %v1391_v5 = vpack.c.bf16 %v999_v49, %v998_v28  ;;  %v977_v42 = vmul.f32 %v2158_v20, %v939_v44 }
 0x274   : > { %v1669_v51 = vpop.eup %1668  ;;  %v978_v16 = vmul.f32 %v2158_v20, %v940_v17 }
 0x275   : > { %1443 = vst [vmem:[%s2179_s23 + $0x30] sm:$0xff] %v1391_v5   ;;  %v1015_v35 = vadd.f32 %v2166_v24, %v977_v42  ;;  %v941_v37 = vmul.f32 %v1669_v51, %v2146_v21 }
 0x276   : > { %v1016_v11 = vadd.f32 %v2166_v24, %v978_v16 }
 0x277   : > { %v1431_v56 = vpack.c.bf16 %v1015_v35, %v1014_v15  ;;  %v979_v26 = vmul.f32 %v2158_v20, %v941_v37 }
 0x279   : > { %1451 = vst [vmem:[%s2179_s23 + $0x70] sm:$0xff] %v1431_v56   ;;  %v1017_v0 = vadd.f32 %v2166_v24, %v979_v26 }
 0x27b   : > { %v1436_v21 = vpack.c.bf16 %v1017_v0, %v1016_v11 }
 0x27d   : > { %1452 = vst [vmem:[%s2179_s23 + $0x78] sm:$0xff] %v1436_v21  }
 0x27e   : > { %1683 = shalt.err (!%p1680_p3)
}
 0x27f   : > { %s1684_s12 = scalar_lea.hbm %s2285_s7, 2048  ;;  %s1688_s15 = scalar_lea.hbm %s2338_s5, 4096 }
 0x280   : > { %p1685_p4 = scmp.ne.s32.totalorder %s2285_s7, %s1684_s12  ;;  %p1689_p9 = scmp.lt.u32.totalorder %s2285_s7, %s2338_s5 }
 0x281   : > { %p1690_p10 = scmp.lt.u32.totalorder %s1688_s15, %s1684_s12  ;;  %p1692_p12 = scmp.lt.u32.totalorder %s1684_s12, %s2285_s7 }
 0x282   : > { %p1686_p7 = pnand %p1685_p4, %p1805_p5 }
 0x283   : > { %p1691_p11 = por %p1690_p10, %p1689_p9 }
 0x284   : > { %p1687_p8 = pneg %p1686_p7 }
 0x285   : > { %p1693_p13 = por %p1692_p12, %p1691_p11 }
 0x287   : > { %p1694_p0 = pnand %p1693_p13, %p1687_p8 }
 0x289   : > { %1697 = shalt.err (!%p1694_p0)
}
 0x28a   : > { %s1735_s23 = smov 64   ;;  %s1736_s25 = smov 4  }
 0x28b   : > { %1541 = dma.vmem_to_hbm [thread:$0]  (%p1805_p5), %s2287_s26, 2048, %s2285_s7, %s2292_s22, %s1735_s23, %s1735_s23, %s1736_s25  }
 0x28c PF: > { %p1547_p1 = scmp.ge.s32.totalorder %s1732_s21, 2  ;;  %s1207_s30 = sand.u32 1, %s1720_s18  }
 0x28d   : > { %s1208_s6 = scalar_lea.sflag [#allocation3], %s1207_s30 }
 0x28e   : > { %p1544_p2 = pnand %p1547_p1, %p1809_p6 }
 0x290   : > { %1715 = dma.done.wait (!%p1544_p2), %s1208_s6, 2048  }
 0x291   : > { %1717 = vsyncadd (!%p1544_p2), %s1208_s6, 4294965248  ;;  %p15_p3 = scmp.ge.s32.totalorder %s1792_s24, 4   ;;  %s2341_s18 = smov %s1724_s19 }
 0x292   : > { %s2342_s19 = smov %s1728_s20  ;;  %s2343_s20 = smov %s1803_s27 }
 0x293   : > { %s2344_s21 = smov %s1792_s24  ;;  %17 = sbr.rel (!%p15_p3) target bundleno = 3 (0x3), region = 75 }
 0x29a   :  { %1213 = vsyncpa [#allocation3], 1 }
 0x29b   :  { %1215 = vsyncpa [#allocation3 + $0x1], 1 }

</bundles_post_ra>
